<compile_context>
chip_gen: v7x
topology: tpu7x:2x2x1
jax: 0.10.0
libtpu: 0.0.40
codegen_flags: <defaults>
</compile_context>

<pallas_src>
import math
import functools

import jax
import jax.numpy as jnp
from jax import lax
from jax.experimental import pallas as pl
from jax.experimental.pallas import tpu as pltpu


# ----------------------------------------------------------------------------
# Pallas kernel: fused bidirectional GRU recurrence for one layer.
# ----------------------------------------------------------------------------
def _bigru_kernel(gi_ref, whh_ref, bhn_ref, out_ref, h_scr):
    """Grid axis 0 = T-chunk (sequential, "arbitrary").

    gi_ref : (Tc, 6H, N) bf16  -- hoisted input projections, gate-interleaved rows
                                  [r_f, r_b, z_f, z_b, n_f, n_b]; the backward rows
                                  are already time-reversed (flipped once in XLA).
    whh_ref: (6H, 2H)    bf16  -- block-diagonal recurrent weights, same row order;
                                  cols [h_fwd | h_bwd].
    bhn_ref: (2H, 1)     f32   -- recurrent bias, n-gate only ([fwd; bwd]); the r/z
                                  recurrent biases were folded into gi in XLA.
    out_ref: (T, 2H, N)  bf16  -- output, rows [h_fwd | h_bwd] per time step
                                  (resident block across all chunks).
    h_scr  : (2H, N)     f32   -- hidden state carried across chunks ([h_fwd; h_bwd]).
    """
    t_chunk = gi_ref.shape[0]
    T = out_ref.shape[0]
    H2 = out_ref.shape[1]          # 2H
    H = H2 // 2
    c = pl.program_id(0)

    @pl.when(c == 0)
    def _init():
        h_scr[...] = jnp.zeros_like(h_scr)

    whh = whh_ref[...]             # resident in VMEM for the whole chunk
    bhn = bhn_ref[...]
    t0 = c * t_chunk

    def step(s, h):
        gi = gi_ref[s].astype(jnp.float32)                        # (6H, N)
        gh = jnp.dot(whh, h.astype(jnp.bfloat16),
                     preferred_element_type=jnp.float32)          # (6H, N)

        r = jax.nn.sigmoid(gi[0:H2] + gh[0:H2])                   # (2H, N)
        z = jax.nn.sigmoid(gi[H2:2 * H2] + gh[H2:2 * H2])
        n = jnp.tanh(gi[2 * H2:3 * H2] + r * (gh[2 * H2:3 * H2] + bhn))
        h_new = (1.0 - z) * n + z * h                             # (2H, N)

        t_f = t0 + s               # forward real time
        t_b = T - 1 - t_f          # backward real time
        out_ref[t_f, 0:H, :] = h_new[0:H].astype(out_ref.dtype)
        out_ref[t_b, H:H2, :] = h_new[H:H2].astype(out_ref.dtype)
        return h_new

    unroll = t_chunk if t_chunk <= 8 else 8
    h_scr[...] = lax.fori_loop(0, t_chunk, step, h_scr[...], unroll=unroll)


def bigru_layer(x_tin, p):
    """x_tin: (T, I, N) -> (T, 2H, N) bf16 for one bidirectional GRU layer."""
    T, I, N = x_tin.shape
    H6, H2 = p["whh"].shape        # 6H, 2H
    H = H2 // 2

    # Hoisted input projection for both directions: one bf16 matmul over all T*N rows.
    gi = jnp.einsum("tin,dgi->tdgn", x_tin.astype(jnp.bfloat16), p["wih"],
                    preferred_element_type=jnp.float32)           # (T, 2, 3H, N)
    gi = gi + p["bi"][None, :, :, None]
    gi_f = gi[:, 0].reshape(T, 3, H, N)
    gi_b = gi[:, 1][::-1].reshape(T, 3, H, N)    # pre-flip the backward direction once
    # Gate-interleave [r_f, r_b, z_f, z_b, n_f, n_b] so in-kernel gate slices are
    # contiguous across both directions; stage in bf16 (halves DMA / VMEM bytes).
    gi = jnp.stack([gi_f, gi_b], axis=2).reshape(T, H6, N).astype(jnp.bfloat16)

    # T-chunk grid: gi is pipelined, hidden state carried in VMEM scratch.
    if T <= 32:
        t_chunk = T
    else:
        t_chunk = 1
        for cand in range(32, 0, -1):
            if T % cand == 0:
                t_chunk = cand
                break
    n_chunks = T // t_chunk

    vmem_bytes = (2 * t_chunk * H6 * N * 2       # gi, double-buffered, bf16
                  + 2 * T * H2 * N * 2           # out block (resident), bf16
                  + 2 * H6 * H2 * 2 + 2 * H2 * 4 # weights / bias
                  + H2 * N * 4)                  # hidden-state scratch
    vmem_limit = int(min(64 << 20, max(16 << 20, 4 * vmem_bytes)))

    flops = 2 * H6 * H2 * N * T                  # per-step block-diagonal matmul
    transcendentals = 3 * H2 * N * T             # 2x sigmoid + tanh per step
    bytes_accessed = T * H6 * N * 2 + T * H2 * N * 2 + H6 * H2 * 2 + H2 * 4

    out = pl.pallas_call(
        _bigru_kernel,
        out_shape=jax.ShapeDtypeStruct((T, H2, N), jnp.bfloat16),
        grid=(n_chunks,),
        in_specs=[
            pl.BlockSpec((t_chunk, H6, N), lambda c: (c, 0, 0)),
            pl.BlockSpec((H6, H2), lambda c: (0, 0)),
            pl.BlockSpec((H2, 1), lambda c: (0, 0)),
        ],
        out_specs=pl.BlockSpec((T, H2, N), lambda c: (0, 0, 0)),
        scratch_shapes=[pltpu.VMEM((H2, N), jnp.float32)],
        compiler_params=pltpu.CompilerParams(
            dimension_semantics=("arbitrary",),
            vmem_limit_bytes=vmem_limit),
        cost_estimate=pl.CostEstimate(
            flops=flops,
            transcendentals=transcendentals,
            bytes_accessed=bytes_accessed),
    )(gi, p["whh"], p["bhn"])
    return out


def bi_gru(x_ntf, gru_params):
    """x_ntf: (N, T, F) batch-first -> (N, T, 2H) f32 multi-layer bidirectional GRU."""
    x = jnp.transpose(x_ntf, (1, 2, 0))          # (T, F, N): batch on the lane axis
    for layer_p in gru_params:
        x = bigru_layer(x, layer_p)
        # TODO(synk): inter-layer GRU dropout (p=0.1) omitted for determinism.
    return jnp.transpose(x, (2, 0, 1)).astype(jnp.float32)


# ----------------------------------------------------------------------------
# Tiny linear heads: plain XLA matmuls (lane widths 2/4/8 -> no useful Pallas tiling).
# ----------------------------------------------------------------------------
def linear(x2d, wt, b):
    """x2d: (M, K), wt: (K, O) pre-transposed, b: (O,) -> (M, O)."""
    return jnp.dot(x2d, wt, preferred_element_type=jnp.float32) + b


# ----------------------------------------------------------------------------
# Parameter init (weights stored in the kernel-friendly fused layouts).
# ----------------------------------------------------------------------------
def init_gru_params(key, input_size, hidden_size, num_layers):
    H = hidden_size
    k = 1.0 / math.sqrt(H)
    layers = []
    for layer in range(num_layers):
        in_sz = input_size if layer == 0 else 2 * H
        key, *ks = jax.random.split(key, 9)
        w_ih = [jax.random.uniform(ks[4 * d + 0], (3 * H, in_sz), minval=-k, maxval=k)
                for d in range(2)]
        w_hh = [jax.random.uniform(ks[4 * d + 1], (3 * H, H), minval=-k, maxval=k)
                for d in range(2)]
        b_ih = [jax.random.uniform(ks[4 * d + 2], (3 * H,), minval=-k, maxval=k)
                for d in range(2)]
        b_hh = [jax.random.uniform(ks[4 * d + 3], (3 * H,), minval=-k, maxval=k)
                for d in range(2)]

        # Fold the r/z components of b_hh into the input-side bias (hoisted to XLA).
        bi = [b_ih[d].at[:2 * H].add(b_hh[d][:2 * H]) for d in range(2)]

        # Block-diagonal, gate-interleaved recurrent weight (6H, 2H):
        # row blocks [r_f, r_b, z_f, z_b, n_f, n_b]; cols [h_fwd | h_bwd].
        whh_big = jnp.zeros((6 * H, 2 * H), jnp.float32)
        for g in range(3):
            whh_big = whh_big.at[(2 * g) * H:(2 * g + 1) * H, 0:H].set(
                w_hh[0][g * H:(g + 1) * H])
            whh_big = whh_big.at[(2 * g + 1) * H:(2 * g + 2) * H, H:2 * H].set(
                w_hh[1][g * H:(g + 1) * H])

        # n-gate recurrent bias (must stay inside r * (...)): (2H, 1), [fwd; bwd].
        bhn = jnp.concatenate([b_hh[0][2 * H:], b_hh[1][2 * H:]]).reshape(2 * H, 1)

        layers.append({
            "wih": jnp.stack(w_ih).astype(jnp.bfloat16),   # (2, 3H, in_sz)
            "bi": jnp.stack(bi).astype(jnp.float32),       # (2, 3H)
            "whh": whh_big.astype(jnp.bfloat16),           # (6H, 2H)
            "bhn": bhn.astype(jnp.float32),                # (2H, 1)
        })
    return layers, key


def xavier_uniform(key, shape):
    fan_out, fan_in = shape
    bound = math.sqrt(6.0 / (fan_in + fan_out))
    return jax.random.uniform(key, shape, minval=-bound, maxval=bound)


def linear_default_init(key, out_features, in_features):
    k = 1.0 / math.sqrt(in_features)
    kw, kb = jax.random.split(key)
    w = jax.random.uniform(kw, (out_features, in_features), minval=-k, maxval=k)
    b = jax.random.uniform(kb, (out_features,), minval=-k, maxval=k)
    return w, b


def init_patch_unified(key, patch_size, expansion_ratio, num_layers):
    hidden = expansion_ratio * patch_size
    params = {}
    # --- PatchClassify ---
    gru_c, key = init_gru_params(key, patch_size, hidden, num_layers)
    key, kc = jax.random.split(key)
    params["cls_gru"] = gru_c
    cls_w = xavier_uniform(kc, (2, 2 * hidden))
    params["cls_wt"] = jnp.asarray(cls_w, jnp.float32).T          # (2H, 2)
    params["cls_b"] = jnp.zeros((2,), jnp.float32)
    # --- PatchDetectorGru ---
    key, kp, kh = jax.random.split(key, 3)
    proj_w, proj_b = linear_default_init(kp, hidden, patch_size)
    head_w, head_b = linear_default_init(kh, patch_size, 2 * hidden)
    params["proj_wt"] = jnp.asarray(proj_w, jnp.float32).T        # (P, H)
    params["proj_b"] = jnp.asarray(proj_b, jnp.float32)
    params["head_wt"] = jnp.asarray(head_w, jnp.float32).T        # (2H, P)
    params["head_b"] = jnp.asarray(head_b, jnp.float32)
    gru_r, key = init_gru_params(key, hidden, hidden, num_layers)
    params["rec_gru"] = gru_r
    return params


# ----------------------------------------------------------------------------
# Forward composition (mirrors the PyTorch module semantics).
# ----------------------------------------------------------------------------
def patch_classify_loss(x, params, patch_size, hidden):
    B, S, C = x.shape
    P = patch_size
    pn = S // P
    # TODO(synk): distortion functions undefined in source; deterministic identity + zero labels.
    labels = jnp.zeros((B, S), jnp.float32)
    xd = jnp.transpose(x, (0, 2, 1)).reshape(B * C, S)
    patches = xd.reshape(B * C, pn, P)                 # unfold(step=size) == reshape
    labels_p = labels.reshape(B, pn, P).sum(-1)
    patch_labels = (labels_p > 0).astype(jnp.int32).reshape(B * pn)

    enc = bi_gru(patches, params["cls_gru"])           # (B*C, pn, 2H)
    logits = linear(enc.reshape(B * C * pn, 2 * hidden),
                    params["cls_wt"], params["cls_b"]).reshape(B * C, pn, 2)
    # Mirrors the torch reshape exactly (folds the channel axis into the class axis).
    logits = logits.reshape(B * pn, -1)

    lse = jax.scipy.special.logsumexp(logits, axis=-1)
    picked = jnp.take_along_axis(logits, patch_labels[:, None], axis=-1)[:, 0]
    return jnp.mean(lse - picked)                      # CrossEntropyLoss (mean)


def patch_recon_loss(x, params, patch_size, hidden, key):
    B, S, C = x.shape
    P = patch_size
    pn = S // P
    xd = jnp.transpose(x, (0, 2, 1)).reshape(B * C, S)
    patches = xd.reshape(B * C, pn, P)

    noise = jax.random.uniform(key, (B * C, pn))
    mask = jnp.ones((B * C, pn), jnp.float32)
    len_keep = int(pn * 0.5)
    mask = mask.at[:, :len_keep].set(0.0)
    ids_shuffle = jnp.argsort(noise, axis=-1)
    ids_restore = jnp.argsort(ids_shuffle, axis=-1)
    mask = jnp.take_along_axis(mask, ids_restore, axis=-1)
    mask3 = jnp.repeat(mask[:, :, None], P, axis=-1)   # (B*C, pn, P)

    mask_patches = jnp.where(mask3 > 0, 0.0, patches)
    proj = linear(mask_patches.reshape(-1, P),
                  params["proj_wt"], params["proj_b"]).reshape(B * C, pn, hidden)
    enc = bi_gru(proj, params["rec_gru"])              # (B*C, pn, 2H)
    recons = linear(enc.reshape(-1, 2 * hidden),
                    params["head_wt"], params["head_b"]).reshape(B * C, pn, P)

    recon_loss = (recons - patches) ** 2
    return jnp.mean(recon_loss * mask3)


def patch_unified_forward(x, params, mask_key, *, patch_size, expansion_ratio):
    hidden = expansion_ratio * patch_size
    classify_loss = patch_classify_loss(x, params, patch_size, hidden)
    recon_loss = patch_recon_loss(x, params, patch_size, hidden, mask_key)
    return classify_loss, recon_loss


# ----------------------------------------------------------------------------
if __name__ == "__main__":
    patch_size = 4
    expansion_ratio = 2
    num_layers = 2

    batch, seq_len, num_channels = 2, 16, 4   # seq_len multiple of patch_size

    key = jax.random.PRNGKey(0)
    key, kx, kmask, kparam = jax.random.split(key, 4)
    x = jax.random.normal(kx, (batch, seq_len, num_channels), dtype=jnp.float32)

    params = init_patch_unified(kparam, patch_size, expansion_ratio, num_layers)

    fwd = jax.jit(functools.partial(patch_unified_forward,
                                    patch_size=patch_size,
                                    expansion_ratio=expansion_ratio))
    classify_loss, recon_loss = fwd(x, params, kmask)
    jax.block_until_ready((classify_loss, recon_loss))

    assert bool(jnp.isfinite(classify_loss)) and bool(jnp.isfinite(recon_loss))
    print("KERNEL_OK")
</pallas_src>

<mosaic_0001>
module attributes {stable_mosaic.version = 11 : i64} {
  func.func @_bigru_kernel(%arg0: i32, %arg1: memref<4x48x8xbf16, #tpu.memory_space<vmem>>, %arg2: memref<48x16xbf16, #tpu.memory_space<vmem>>, %arg3: memref<16x1xf32, #tpu.memory_space<vmem>>, %arg4: memref<4x16x8xbf16, #tpu.memory_space<vmem>>, %arg5: memref<16x8xf32, #tpu.memory_space<vmem>>) attributes {dimension_semantics = [#tpu.dimension_semantics<arbitrary>], iteration_bounds = array<i64: 1>, scalar_prefetch = 0 : i64, scratch_operands = 1 : i64, tpu.core_type = #tpu.core_type<tc>, window_params = [{transform_indices = @transform_0, window_bounds = array<i64: 4, 48, 8>}, {pipeline_mode = #tpu.pipeline_mode<synchronous>, transform_indices = @transform_1, window_bounds = array<i64: 48, 16>}, {pipeline_mode = #tpu.pipeline_mode<synchronous>, transform_indices = @transform_2, window_bounds = array<i64: 16, 1>}, {pipeline_mode = #tpu.pipeline_mode<synchronous>, transform_indices = @transform_3, window_bounds = array<i64: 4, 16, 8>}]} {
    %c0_i32 = arith.constant 0 : i32
    %0 = arith.cmpi eq, %arg0, %c0_i32 : i32
    %1 = arith.extui %0 : i1 to i32
    %c0_i32_0 = arith.constant 0 : i32
    %2 = arith.cmpi ne, %1, %c0_i32_0 : i32
    scf.if %2 {
      %cst_52 = arith.constant 0.000000e+00 : f32
      %200 = vector.broadcast %cst_52 : f32 to vector<16x8xf32>
      %c0_53 = arith.constant 0 : index
      %c0_54 = arith.constant 0 : index
      %201 = vector.load %arg5[%c0_53, %c0_54] : memref<16x8xf32, #tpu.memory_space<vmem>>, vector<16x8xf32>
      tpu.vector_store %arg5[%c0_53, %c0_54], %200 {strides = array<i32>} : memref<16x8xf32, #tpu.memory_space<vmem>>, vector<16x8xf32>,
    } else {
    }
    %c0 = arith.constant 0 : index
    %c0_1 = arith.constant 0 : index
    %3 = vector.load %arg2[%c0, %c0_1] : memref<48x16xbf16, #tpu.memory_space<vmem>>, vector<48x16xbf16>
    %c0_2 = arith.constant 0 : index
    %c0_3 = arith.constant 0 : index
    %4 = vector.load %arg3[%c0_2, %c0_3] : memref<16x1xf32, #tpu.memory_space<vmem>>, vector<16x1xf32>
    %c4_i32 = arith.constant 4 : i32
    %5 = arith.muli %arg0, %c4_i32 : i32
    %c0_4 = arith.constant 0 : index
    %c0_5 = arith.constant 0 : index
    %6 = vector.load %arg5[%c0_4, %c0_5] : memref<16x8xf32, #tpu.memory_space<vmem>>, vector<16x8xf32>
    %c0_i32_6 = arith.constant 0 : i32
    %7 = arith.index_cast %c0_i32_6 : i32 to index
    %c0_7 = arith.constant 0 : index
    %c0_8 = arith.constant 0 : index
    %8 = vector.load %arg1[%7, %c0_7, %c0_8] : memref<4x48x8xbf16, #tpu.memory_space<vmem>>, vector<1x48x8xbf16>
    %9 = vector.shape_cast %8 : vector<1x48x8xbf16> to vector<48x8xbf16>
    %10 = arith.extf %9 : vector<48x8xbf16> to vector<48x8xf32>
    %11 = arith.truncf %6 : vector<16x8xf32> to vector<16x8xbf16>
    %cst = arith.constant dense<0.000000e+00> : vector<48x8xf32>
    %12 = tpu.matmul %3, %11, %cst {dimension_numbers = #tpu.dot_dimension_numbers<[1], [0], [0], [1], [0, 0, 1, 1], [], []>} : vector<48x16xbf16>, vector<16x8xbf16>, vector<48x8xf32> -> vector<48x8xf32>
    %13 = vector.extract_strided_slice %10 {offsets = [0, 0], sizes = [16, 8], strides = [1, 1]} : vector<48x8xf32> to vector<16x8xf32>
    %14 = vector.extract_strided_slice %12 {offsets = [0, 0], sizes = [16, 8], strides = [1, 1]} : vector<48x8xf32> to vector<16x8xf32>
    %15 = arith.addf %13, %14 : vector<16x8xf32>
    %16 = arith.negf %15 : vector<16x8xf32>
    %17 = math.exp %16 : vector<16x8xf32>
    %cst_9 = arith.constant 1.000000e+00 : f32
    %18 = vector.broadcast %cst_9 : f32 to vector<16x8xf32>
    %19 = arith.addf %18, %17 : vector<16x8xf32>
    %20 = arith.divf %18, %19 : vector<16x8xf32>
    %21 = vector.extract_strided_slice %10 {offsets = [16, 0], sizes = [16, 8], strides = [1, 1]} : vector<48x8xf32> to vector<16x8xf32>
    %22 = vector.extract_strided_slice %12 {offsets = [16, 0], sizes = [16, 8], strides = [1, 1]} : vector<48x8xf32> to vector<16x8xf32>
    %23 = arith.addf %21, %22 : vector<16x8xf32>
    %24 = arith.negf %23 : vector<16x8xf32>
    %25 = math.exp %24 : vector<16x8xf32>
    %cst_10 = arith.constant 1.000000e+00 : f32
    %26 = vector.broadcast %cst_10 : f32 to vector<16x8xf32>
    %27 = arith.addf %26, %25 : vector<16x8xf32>
    %28 = arith.divf %26, %27 : vector<16x8xf32>
    %29 = vector.extract_strided_slice %10 {offsets = [32, 0], sizes = [16, 8], strides = [1, 1]} : vector<48x8xf32> to vector<16x8xf32>
    %30 = vector.extract_strided_slice %12 {offsets = [32, 0], sizes = [16, 8], strides = [1, 1]} : vector<48x8xf32> to vector<16x8xf32>
    %31 = vector.broadcast %4 : vector<16x1xf32> to vector<16x8xf32>
    %32 = arith.addf %30, %31 : vector<16x8xf32>
    %33 = arith.mulf %20, %32 : vector<16x8xf32>
    %34 = arith.addf %29, %33 : vector<16x8xf32>
    %35 = math.tanh %34 : vector<16x8xf32>
    %cst_11 = arith.constant 1.000000e+00 : f32
    %36 = vector.broadcast %cst_11 : f32 to vector<16x8xf32>
    %37 = arith.subf %36, %28 : vector<16x8xf32>
    %38 = arith.mulf %37, %35 : vector<16x8xf32>
    %39 = arith.mulf %28, %6 : vector<16x8xf32>
    %40 = arith.addf %38, %39 : vector<16x8xf32>
    %41 = arith.addi %5, %c0_i32_6 : i32
    %c3_i32 = arith.constant 3 : i32
    %42 = arith.subi %c3_i32, %41 : i32
    %43 = vector.extract_strided_slice %40 {offsets = [0, 0], sizes = [8, 8], strides = [1, 1]} : vector<16x8xf32> to vector<8x8xf32>
    %44 = arith.truncf %43 : vector<8x8xf32> to vector<8x8xbf16>
    %45 = arith.index_cast %41 : i32 to index
    %c0_12 = arith.constant 0 : index
    %c0_13 = arith.constant 0 : index
    %46 = vector.load %arg4[%45, %c0_12, %c0_13] : memref<4x16x8xbf16, #tpu.memory_space<vmem>>, vector<1x8x8xbf16>
    %47 = vector.shape_cast %46 : vector<1x8x8xbf16> to vector<8x8xbf16>
    %48 = vector.shape_cast %44 : vector<8x8xbf16> to vector<1x8x8xbf16>
    tpu.vector_store %arg4[%45, %c0_12, %c0_13], %48 {strides = array<i32>} : memref<4x16x8xbf16, #tpu.memory_space<vmem>>, vector<1x8x8xbf16>,
    %49 = vector.extract_strided_slice %40 {offsets = [8, 0], sizes = [8, 8], strides = [1, 1]} : vector<16x8xf32> to vector<8x8xf32>
    %50 = arith.truncf %49 : vector<8x8xf32> to vector<8x8xbf16>
    %51 = arith.index_cast %42 : i32 to index
    %c8 = arith.constant 8 : index
    %c0_14 = arith.constant 0 : index
    %52 = vector.load %arg4[%51, %c8, %c0_14] : memref<4x16x8xbf16, #tpu.memory_space<vmem>>, vector<1x8x8xbf16>
    %53 = vector.shape_cast %52 : vector<1x8x8xbf16> to vector<8x8xbf16>
    %54 = vector.shape_cast %50 : vector<8x8xbf16> to vector<1x8x8xbf16>
    tpu.vector_store %arg4[%51, %c8, %c0_14], %54 {strides = array<i32>} : memref<4x16x8xbf16, #tpu.memory_space<vmem>>, vector<1x8x8xbf16>,
    %c1_i32 = arith.constant 1 : i32
    %55 = arith.index_cast %c1_i32 : i32 to index
    %c0_15 = arith.constant 0 : index
    %c0_16 = arith.constant 0 : index
    %56 = vector.load %arg1[%55, %c0_15, %c0_16] : memref<4x48x8xbf16, #tpu.memory_space<vmem>>, vector<1x48x8xbf16>
    %57 = vector.shape_cast %56 : vector<1x48x8xbf16> to vector<48x8xbf16>
    %58 = arith.extf %57 : vector<48x8xbf16> to vector<48x8xf32>
    %59 = arith.truncf %40 : vector<16x8xf32> to vector<16x8xbf16>
    %cst_17 = arith.constant dense<0.000000e+00> : vector<48x8xf32>
    %60 = tpu.matmul %3, %59, %cst_17 {dimension_numbers = #tpu.dot_dimension_numbers<[1], [0], [0], [1], [0, 0, 1, 1], [], []>} : vector<48x16xbf16>, vector<16x8xbf16>, vector<48x8xf32> -> vector<48x8xf32>
    %61 = vector.extract_strided_slice %58 {offsets = [0, 0], sizes = [16, 8], strides = [1, 1]} : vector<48x8xf32> to vector<16x8xf32>
    %62 = vector.extract_strided_slice %60 {offsets = [0, 0], sizes = [16, 8], strides = [1, 1]} : vector<48x8xf32> to vector<16x8xf32>
    %63 = arith.addf %61, %62 : vector<16x8xf32>
    %64 = arith.negf %63 : vector<16x8xf32>
    %65 = math.exp %64 : vector<16x8xf32>
    %cst_18 = arith.constant 1.000000e+00 : f32
    %66 = vector.broadcast %cst_18 : f32 to vector<16x8xf32>
    %67 = arith.addf %66, %65 : vector<16x8xf32>
    %68 = arith.divf %66, %67 : vector<16x8xf32>
    %69 = vector.extract_strided_slice %58 {offsets = [16, 0], sizes = [16, 8], strides = [1, 1]} : vector<48x8xf32> to vector<16x8xf32>
    %70 = vector.extract_strided_slice %60 {offsets = [16, 0], sizes = [16, 8], strides = [1, 1]} : vector<48x8xf32> to vector<16x8xf32>
    %71 = arith.addf %69, %70 : vector<16x8xf32>
    %72 = arith.negf %71 : vector<16x8xf32>
    %73 = math.exp %72 : vector<16x8xf32>
    %cst_19 = arith.constant 1.000000e+00 : f32
    %74 = vector.broadcast %cst_19 : f32 to vector<16x8xf32>
    %75 = arith.addf %74, %73 : vector<16x8xf32>
    %76 = arith.divf %74, %75 : vector<16x8xf32>
    %77 = vector.extract_strided_slice %58 {offsets = [32, 0], sizes = [16, 8], strides = [1, 1]} : vector<48x8xf32> to vector<16x8xf32>
    %78 = vector.extract_strided_slice %60 {offsets = [32, 0], sizes = [16, 8], strides = [1, 1]} : vector<48x8xf32> to vector<16x8xf32>
    %79 = vector.broadcast %4 : vector<16x1xf32> to vector<16x8xf32>
    %80 = arith.addf %78, %79 : vector<16x8xf32>
    %81 = arith.mulf %68, %80 : vector<16x8xf32>
    %82 = arith.addf %77, %81 : vector<16x8xf32>
    %83 = math.tanh %82 : vector<16x8xf32>
    %cst_20 = arith.constant 1.000000e+00 : f32
    %84 = vector.broadcast %cst_20 : f32 to vector<16x8xf32>
    %85 = arith.subf %84, %76 : vector<16x8xf32>
    %86 = arith.mulf %85, %83 : vector<16x8xf32>
    %87 = arith.mulf %76, %40 : vector<16x8xf32>
    %88 = arith.addf %86, %87 : vector<16x8xf32>
    %89 = arith.addi %5, %c1_i32 : i32
    %c3_i32_21 = arith.constant 3 : i32
    %90 = arith.subi %c3_i32_21, %89 : i32
    %91 = vector.extract_strided_slice %88 {offsets = [0, 0], sizes = [8, 8], strides = [1, 1]} : vector<16x8xf32> to vector<8x8xf32>
    %92 = arith.truncf %91 : vector<8x8xf32> to vector<8x8xbf16>
    %93 = arith.index_cast %89 : i32 to index
    %c0_22 = arith.constant 0 : index
    %c0_23 = arith.constant 0 : index
    %94 = vector.load %arg4[%93, %c0_22, %c0_23] : memref<4x16x8xbf16, #tpu.memory_space<vmem>>, vector<1x8x8xbf16>
    %95 = vector.shape_cast %94 : vector<1x8x8xbf16> to vector<8x8xbf16>
    %96 = vector.shape_cast %92 : vector<8x8xbf16> to vector<1x8x8xbf16>
    tpu.vector_store %arg4[%93, %c0_22, %c0_23], %96 {strides = array<i32>} : memref<4x16x8xbf16, #tpu.memory_space<vmem>>, vector<1x8x8xbf16>,
    %97 = vector.extract_strided_slice %88 {offsets = [8, 0], sizes = [8, 8], strides = [1, 1]} : vector<16x8xf32> to vector<8x8xf32>
    %98 = arith.truncf %97 : vector<8x8xf32> to vector<8x8xbf16>
    %99 = arith.index_cast %90 : i32 to index
    %c8_24 = arith.constant 8 : index
    %c0_25 = arith.constant 0 : index
    %100 = vector.load %arg4[%99, %c8_24, %c0_25] : memref<4x16x8xbf16, #tpu.memory_space<vmem>>, vector<1x8x8xbf16>
    %101 = vector.shape_cast %100 : vector<1x8x8xbf16> to vector<8x8xbf16>
    %102 = vector.shape_cast %98 : vector<8x8xbf16> to vector<1x8x8xbf16>
    tpu.vector_store %arg4[%99, %c8_24, %c0_25], %102 {strides = array<i32>} : memref<4x16x8xbf16, #tpu.memory_space<vmem>>, vector<1x8x8xbf16>,
    %c2_i32 = arith.constant 2 : i32
    %103 = arith.index_cast %c2_i32 : i32 to index
    %c0_26 = arith.constant 0 : index
    %c0_27 = arith.constant 0 : index
    %104 = vector.load %arg1[%103, %c0_26, %c0_27] : memref<4x48x8xbf16, #tpu.memory_space<vmem>>, vector<1x48x8xbf16>
    %105 = vector.shape_cast %104 : vector<1x48x8xbf16> to vector<48x8xbf16>
    %106 = arith.extf %105 : vector<48x8xbf16> to vector<48x8xf32>
    %107 = arith.truncf %88 : vector<16x8xf32> to vector<16x8xbf16>
    %cst_28 = arith.constant dense<0.000000e+00> : vector<48x8xf32>
    %108 = tpu.matmul %3, %107, %cst_28 {dimension_numbers = #tpu.dot_dimension_numbers<[1], [0], [0], [1], [0, 0, 1, 1], [], []>} : vector<48x16xbf16>, vector<16x8xbf16>, vector<48x8xf32> -> vector<48x8xf32>
    %109 = vector.extract_strided_slice %106 {offsets = [0, 0], sizes = [16, 8], strides = [1, 1]} : vector<48x8xf32> to vector<16x8xf32>
    %110 = vector.extract_strided_slice %108 {offsets = [0, 0], sizes = [16, 8], strides = [1, 1]} : vector<48x8xf32> to vector<16x8xf32>
    %111 = arith.addf %109, %110 : vector<16x8xf32>
    %112 = arith.negf %111 : vector<16x8xf32>
    %113 = math.exp %112 : vector<16x8xf32>
    %cst_29 = arith.constant 1.000000e+00 : f32
    %114 = vector.broadcast %cst_29 : f32 to vector<16x8xf32>
    %115 = arith.addf %114, %113 : vector<16x8xf32>
    %116 = arith.divf %114, %115 : vector<16x8xf32>
    %117 = vector.extract_strided_slice %106 {offsets = [16, 0], sizes = [16, 8], strides = [1, 1]} : vector<48x8xf32> to vector<16x8xf32>
    %118 = vector.extract_strided_slice %108 {offsets = [16, 0], sizes = [16, 8], strides = [1, 1]} : vector<48x8xf32> to vector<16x8xf32>
    %119 = arith.addf %117, %118 : vector<16x8xf32>
    %120 = arith.negf %119 : vector<16x8xf32>
    %121 = math.exp %120 : vector<16x8xf32>
    %cst_30 = arith.constant 1.000000e+00 : f32
    %122 = vector.broadcast %cst_30 : f32 to vector<16x8xf32>
    %123 = arith.addf %122, %121 : vector<16x8xf32>
    %124 = arith.divf %122, %123 : vector<16x8xf32>
    %125 = vector.extract_strided_slice %106 {offsets = [32, 0], sizes = [16, 8], strides = [1, 1]} : vector<48x8xf32> to vector<16x8xf32>
    %126 = vector.extract_strided_slice %108 {offsets = [32, 0], sizes = [16, 8], strides = [1, 1]} : vector<48x8xf32> to vector<16x8xf32>
    %127 = vector.broadcast %4 : vector<16x1xf32> to vector<16x8xf32>
    %128 = arith.addf %126, %127 : vector<16x8xf32>
    %129 = arith.mulf %116, %128 : vector<16x8xf32>
    %130 = arith.addf %125, %129 : vector<16x8xf32>
    %131 = math.tanh %130 : vector<16x8xf32>
    %cst_31 = arith.constant 1.000000e+00 : f32
    %132 = vector.broadcast %cst_31 : f32 to vector<16x8xf32>
    %133 = arith.subf %132, %124 : vector<16x8xf32>
    %134 = arith.mulf %133, %131 : vector<16x8xf32>
    %135 = arith.mulf %124, %88 : vector<16x8xf32>
    %136 = arith.addf %134, %135 : vector<16x8xf32>
    %137 = arith.addi %5, %c2_i32 : i32
    %c3_i32_32 = arith.constant 3 : i32
    %138 = arith.subi %c3_i32_32, %137 : i32
    %139 = vector.extract_strided_slice %136 {offsets = [0, 0], sizes = [8, 8], strides = [1, 1]} : vector<16x8xf32> to vector<8x8xf32>
    %140 = arith.truncf %139 : vector<8x8xf32> to vector<8x8xbf16>
    %141 = arith.index_cast %137 : i32 to index
    %c0_33 = arith.constant 0 : index
    %c0_34 = arith.constant 0 : index
    %142 = vector.load %arg4[%141, %c0_33, %c0_34] : memref<4x16x8xbf16, #tpu.memory_space<vmem>>, vector<1x8x8xbf16>
    %143 = vector.shape_cast %142 : vector<1x8x8xbf16> to vector<8x8xbf16>
    %144 = vector.shape_cast %140 : vector<8x8xbf16> to vector<1x8x8xbf16>
    tpu.vector_store %arg4[%141, %c0_33, %c0_34], %144 {strides = array<i32>} : memref<4x16x8xbf16, #tpu.memory_space<vmem>>, vector<1x8x8xbf16>,
    %145 = vector.extract_strided_slice %136 {offsets = [8, 0], sizes = [8, 8], strides = [1, 1]} : vector<16x8xf32> to vector<8x8xf32>
    %146 = arith.truncf %145 : vector<8x8xf32> to vector<8x8xbf16>
    %147 = arith.index_cast %138 : i32 to index
    %c8_35 = arith.constant 8 : index
    %c0_36 = arith.constant 0 : index
    %148 = vector.load %arg4[%147, %c8_35, %c0_36] : memref<4x16x8xbf16, #tpu.memory_space<vmem>>, vector<1x8x8xbf16>
    %149 = vector.shape_cast %148 : vector<1x8x8xbf16> to vector<8x8xbf16>
    %150 = vector.shape_cast %146 : vector<8x8xbf16> to vector<1x8x8xbf16>
    tpu.vector_store %arg4[%147, %c8_35, %c0_36], %150 {strides = array<i32>} : memref<4x16x8xbf16, #tpu.memory_space<vmem>>, vector<1x8x8xbf16>,
    %c3_i32_37 = arith.constant 3 : i32
    %151 = arith.index_cast %c3_i32_37 : i32 to index
    %c0_38 = arith.constant 0 : index
    %c0_39 = arith.constant 0 : index
    %152 = vector.load %arg1[%151, %c0_38, %c0_39] : memref<4x48x8xbf16, #tpu.memory_space<vmem>>, vector<1x48x8xbf16>
    %153 = vector.shape_cast %152 : vector<1x48x8xbf16> to vector<48x8xbf16>
    %154 = arith.extf %153 : vector<48x8xbf16> to vector<48x8xf32>
    %155 = arith.truncf %136 : vector<16x8xf32> to vector<16x8xbf16>
    %cst_40 = arith.constant dense<0.000000e+00> : vector<48x8xf32>
    %156 = tpu.matmul %3, %155, %cst_40 {dimension_numbers = #tpu.dot_dimension_numbers<[1], [0], [0], [1], [0, 0, 1, 1], [], []>} : vector<48x16xbf16>, vector<16x8xbf16>, vector<48x8xf32> -> vector<48x8xf32>
    %157 = vector.extract_strided_slice %154 {offsets = [0, 0], sizes = [16, 8], strides = [1, 1]} : vector<48x8xf32> to vector<16x8xf32>
    %158 = vector.extract_strided_slice %156 {offsets = [0, 0], sizes = [16, 8], strides = [1, 1]} : vector<48x8xf32> to vector<16x8xf32>
    %159 = arith.addf %157, %158 : vector<16x8xf32>
    %160 = arith.negf %159 : vector<16x8xf32>
    %161 = math.exp %160 : vector<16x8xf32>
    %cst_41 = arith.constant 1.000000e+00 : f32
    %162 = vector.broadcast %cst_41 : f32 to vector<16x8xf32>
    %163 = arith.addf %162, %161 : vector<16x8xf32>
    %164 = arith.divf %162, %163 : vector<16x8xf32>
    %165 = vector.extract_strided_slice %154 {offsets = [16, 0], sizes = [16, 8], strides = [1, 1]} : vector<48x8xf32> to vector<16x8xf32>
    %166 = vector.extract_strided_slice %156 {offsets = [16, 0], sizes = [16, 8], strides = [1, 1]} : vector<48x8xf32> to vector<16x8xf32>
    %167 = arith.addf %165, %166 : vector<16x8xf32>
    %168 = arith.negf %167 : vector<16x8xf32>
    %169 = math.exp %168 : vector<16x8xf32>
    %cst_42 = arith.constant 1.000000e+00 : f32
    %170 = vector.broadcast %cst_42 : f32 to vector<16x8xf32>
    %171 = arith.addf %170, %169 : vector<16x8xf32>
    %172 = arith.divf %170, %171 : vector<16x8xf32>
    %173 = vector.extract_strided_slice %154 {offsets = [32, 0], sizes = [16, 8], strides = [1, 1]} : vector<48x8xf32> to vector<16x8xf32>
    %174 = vector.extract_strided_slice %156 {offsets = [32, 0], sizes = [16, 8], strides = [1, 1]} : vector<48x8xf32> to vector<16x8xf32>
    %175 = vector.broadcast %4 : vector<16x1xf32> to vector<16x8xf32>
    %176 = arith.addf %174, %175 : vector<16x8xf32>
    %177 = arith.mulf %164, %176 : vector<16x8xf32>
    %178 = arith.addf %173, %177 : vector<16x8xf32>
    %179 = math.tanh %178 : vector<16x8xf32>
    %cst_43 = arith.constant 1.000000e+00 : f32
    %180 = vector.broadcast %cst_43 : f32 to vector<16x8xf32>
    %181 = arith.subf %180, %172 : vector<16x8xf32>
    %182 = arith.mulf %181, %179 : vector<16x8xf32>
    %183 = arith.mulf %172, %136 : vector<16x8xf32>
    %184 = arith.addf %182, %183 : vector<16x8xf32>
    %185 = arith.addi %5, %c3_i32_37 : i32
    %c3_i32_44 = arith.constant 3 : i32
    %186 = arith.subi %c3_i32_44, %185 : i32
    %187 = vector.extract_strided_slice %184 {offsets = [0, 0], sizes = [8, 8], strides = [1, 1]} : vector<16x8xf32> to vector<8x8xf32>
    %188 = arith.truncf %187 : vector<8x8xf32> to vector<8x8xbf16>
    %189 = arith.index_cast %185 : i32 to index
    %c0_45 = arith.constant 0 : index
    %c0_46 = arith.constant 0 : index
    %190 = vector.load %arg4[%189, %c0_45, %c0_46] : memref<4x16x8xbf16, #tpu.memory_space<vmem>>, vector<1x8x8xbf16>
    %191 = vector.shape_cast %190 : vector<1x8x8xbf16> to vector<8x8xbf16>
    %192 = vector.shape_cast %188 : vector<8x8xbf16> to vector<1x8x8xbf16>
    tpu.vector_store %arg4[%189, %c0_45, %c0_46], %192 {strides = array<i32>} : memref<4x16x8xbf16, #tpu.memory_space<vmem>>, vector<1x8x8xbf16>,
    %193 = vector.extract_strided_slice %184 {offsets = [8, 0], sizes = [8, 8], strides = [1, 1]} : vector<16x8xf32> to vector<8x8xf32>
    %194 = arith.truncf %193 : vector<8x8xf32> to vector<8x8xbf16>
    %195 = arith.index_cast %186 : i32 to index
    %c8_47 = arith.constant 8 : index
    %c0_48 = arith.constant 0 : index
    %196 = vector.load %arg4[%195, %c8_47, %c0_48] : memref<4x16x8xbf16, #tpu.memory_space<vmem>>, vector<1x8x8xbf16>
    %197 = vector.shape_cast %196 : vector<1x8x8xbf16> to vector<8x8xbf16>
    %198 = vector.shape_cast %194 : vector<8x8xbf16> to vector<1x8x8xbf16>
    tpu.vector_store %arg4[%195, %c8_47, %c0_48], %198 {strides = array<i32>} : memref<4x16x8xbf16, #tpu.memory_space<vmem>>, vector<1x8x8xbf16>,
    %c4_i32_49 = arith.constant 4 : i32
    %c0_50 = arith.constant 0 : index
    %c0_51 = arith.constant 0 : index
    %199 = vector.load %arg5[%c0_50, %c0_51] : memref<16x8xf32, #tpu.memory_space<vmem>>, vector<16x8xf32>
    tpu.vector_store %arg5[%c0_50, %c0_51], %184 {strides = array<i32>} : memref<16x8xf32, #tpu.memory_space<vmem>>, vector<16x8xf32>,
    return
  }
  func.func @transform_0(%arg0: i32) -> (i32, i32, i32) {
    %c0_i32 = arith.constant 0 : i32
    %c0_i32_0 = arith.constant 0 : i32
    %c0_i32_1 = arith.constant 0 : i32
    return %arg0, %c0_i32, %c0_i32_0 : i32, i32, i32
  }
  func.func @transform_1(%arg0: i32) -> (i32, i32) {
    %c0_i32 = arith.constant 0 : i32
    %c0_i32_0 = arith.constant 0 : i32
    %c0_i32_1 = arith.constant 0 : i32
    return %c0_i32, %c0_i32_0 : i32, i32
  }
  func.func @transform_2(%arg0: i32) -> (i32, i32) {
    %c0_i32 = arith.constant 0 : i32
    %c0_i32_0 = arith.constant 0 : i32
    %c0_i32_1 = arith.constant 0 : i32
    return %c0_i32, %c0_i32_0 : i32, i32
  }
  func.func @transform_3(%arg0: i32) -> (i32, i32, i32) {
    %c0_i32 = arith.constant 0 : i32
    %c0_i32_0 = arith.constant 0 : i32
    %c0_i32_1 = arith.constant 0 : i32
    %c0_i32_2 = arith.constant 0 : i32
    return %c0_i32, %c0_i32_0, %c0_i32_1 : i32, i32, i32
  }
}

module attributes {stable_mosaic.version = 11 : i64} {
  func.func @_bigru_kernel(%arg0: i32, %arg1: memref<4x48x8xbf16, #tpu.memory_space<vmem>>, %arg2: memref<48x16xbf16, #tpu.memory_space<vmem>>, %arg3: memref<16x1xf32, #tpu.memory_space<vmem>>, %arg4: memref<4x16x8xbf16, #tpu.memory_space<vmem>>, %arg5: memref<16x8xf32, #tpu.memory_space<vmem>>) attributes {dimension_semantics = [#tpu.dimension_semantics<arbitrary>], iteration_bounds = array<i64: 1>, scalar_prefetch = 0 : i64, scratch_operands = 1 : i64, tpu.core_type = #tpu.core_type<tc>, window_params = [{transform_indices = @transform_0, window_bounds = array<i64: 4, 48, 8>}, {pipeline_mode = #tpu.pipeline_mode<synchronous>, transform_indices = @transform_1, window_bounds = array<i64: 48, 16>}, {pipeline_mode = #tpu.pipeline_mode<synchronous>, transform_indices = @transform_2, window_bounds = array<i64: 16, 1>}, {pipeline_mode = #tpu.pipeline_mode<synchronous>, transform_indices = @transform_3, window_bounds = array<i64: 4, 16, 8>}]} {
    %c0_i32 = arith.constant 0 : i32
    %0 = arith.cmpi eq, %arg0, %c0_i32 : i32
    %1 = arith.extui %0 : i1 to i32
    %c0_i32_0 = arith.constant 0 : i32
    %2 = arith.cmpi ne, %1, %c0_i32_0 : i32
    scf.if %2 {
      %cst_52 = arith.constant 0.000000e+00 : f32
      %200 = vector.broadcast %cst_52 : f32 to vector<16x8xf32>
      %c0_53 = arith.constant 0 : index
      %c0_54 = arith.constant 0 : index
      %201 = vector.load %arg5[%c0_53, %c0_54] : memref<16x8xf32, #tpu.memory_space<vmem>>, vector<16x8xf32>
      tpu.vector_store %arg5[%c0_53, %c0_54], %200 {strides = array<i32>} : memref<16x8xf32, #tpu.memory_space<vmem>>, vector<16x8xf32>,
    } else {
    }
    %c0 = arith.constant 0 : index
    %c0_1 = arith.constant 0 : index
    %3 = vector.load %arg2[%c0, %c0_1] : memref<48x16xbf16, #tpu.memory_space<vmem>>, vector<48x16xbf16>
    %c0_2 = arith.constant 0 : index
    %c0_3 = arith.constant 0 : index
    %4 = vector.load %arg3[%c0_2, %c0_3] : memref<16x1xf32, #tpu.memory_space<vmem>>, vector<16x1xf32>
    %c4_i32 = arith.constant 4 : i32
    %5 = arith.muli %arg0, %c4_i32 : i32
    %c0_4 = arith.constant 0 : index
    %c0_5 = arith.constant 0 : index
    %6 = vector.load %arg5[%c0_4, %c0_5] : memref<16x8xf32, #tpu.memory_space<vmem>>, vector<16x8xf32>
    %c0_i32_6 = arith.constant 0 : i32
    %7 = arith.index_cast %c0_i32_6 : i32 to index
    %c0_7 = arith.constant 0 : index
    %c0_8 = arith.constant 0 : index
    %8 = vector.load %arg1[%7, %c0_7, %c0_8] : memref<4x48x8xbf16, #tpu.memory_space<vmem>>, vector<1x48x8xbf16>
    %9 = vector.shape_cast %8 : vector<1x48x8xbf16> to vector<48x8xbf16>
    %10 = arith.extf %9 : vector<48x8xbf16> to vector<48x8xf32>
    %11 = arith.truncf %6 : vector<16x8xf32> to vector<16x8xbf16>
    %cst = arith.constant dense<0.000000e+00> : vector<48x8xf32>
    %12 = tpu.matmul %3, %11, %cst {dimension_numbers = #tpu.dot_dimension_numbers<[1], [0], [0], [1], [0, 0, 1, 1], [], []>} : vector<48x16xbf16>, vector<16x8xbf16>, vector<48x8xf32> -> vector<48x8xf32>
    %13 = vector.extract_strided_slice %10 {offsets = [0, 0], sizes = [16, 8], strides = [1, 1]} : vector<48x8xf32> to vector<16x8xf32>
    %14 = vector.extract_strided_slice %12 {offsets = [0, 0], sizes = [16, 8], strides = [1, 1]} : vector<48x8xf32> to vector<16x8xf32>
    %15 = arith.addf %13, %14 : vector<16x8xf32>
    %16 = arith.negf %15 : vector<16x8xf32>
    %17 = math.exp %16 : vector<16x8xf32>
    %cst_9 = arith.constant 1.000000e+00 : f32
    %18 = vector.broadcast %cst_9 : f32 to vector<16x8xf32>
    %19 = arith.addf %18, %17 : vector<16x8xf32>
    %20 = arith.divf %18, %19 : vector<16x8xf32>
    %21 = vector.extract_strided_slice %10 {offsets = [16, 0], sizes = [16, 8], strides = [1, 1]} : vector<48x8xf32> to vector<16x8xf32>
    %22 = vector.extract_strided_slice %12 {offsets = [16, 0], sizes = [16, 8], strides = [1, 1]} : vector<48x8xf32> to vector<16x8xf32>
    %23 = arith.addf %21, %22 : vector<16x8xf32>
    %24 = arith.negf %23 : vector<16x8xf32>
    %25 = math.exp %24 : vector<16x8xf32>
    %cst_10 = arith.constant 1.000000e+00 : f32
    %26 = vector.broadcast %cst_10 : f32 to vector<16x8xf32>
    %27 = arith.addf %26, %25 : vector<16x8xf32>
    %28 = arith.divf %26, %27 : vector<16x8xf32>
    %29 = vector.extract_strided_slice %10 {offsets = [32, 0], sizes = [16, 8], strides = [1, 1]} : vector<48x8xf32> to vector<16x8xf32>
    %30 = vector.extract_strided_slice %12 {offsets = [32, 0], sizes = [16, 8], strides = [1, 1]} : vector<48x8xf32> to vector<16x8xf32>
    %31 = vector.broadcast %4 : vector<16x1xf32> to vector<16x8xf32>
    %32 = arith.addf %30, %31 : vector<16x8xf32>
    %33 = arith.mulf %20, %32 : vector<16x8xf32>
    %34 = arith.addf %29, %33 : vector<16x8xf32>
    %35 = math.tanh %34 : vector<16x8xf32>
    %cst_11 = arith.constant 1.000000e+00 : f32
    %36 = vector.broadcast %cst_11 : f32 to vector<16x8xf32>
    %37 = arith.subf %36, %28 : vector<16x8xf32>
    %38 = arith.mulf %37, %35 : vector<16x8xf32>
    %39 = arith.mulf %28, %6 : vector<16x8xf32>
    %40 = arith.addf %38, %39 : vector<16x8xf32>
    %41 = arith.addi %5, %c0_i32_6 : i32
    %c3_i32 = arith.constant 3 : i32
    %42 = arith.subi %c3_i32, %41 : i32
    %43 = vector.extract_strided_slice %40 {offsets = [0, 0], sizes = [8, 8], strides = [1, 1]} : vector<16x8xf32> to vector<8x8xf32>
    %44 = arith.truncf %43 : vector<8x8xf32> to vector<8x8xbf16>
    %45 = arith.index_cast %41 : i32 to index
    %c0_12 = arith.constant 0 : index
    %c0_13 = arith.constant 0 : index
    %46 = vector.load %arg4[%45, %c0_12, %c0_13] : memref<4x16x8xbf16, #tpu.memory_space<vmem>>, vector<1x8x8xbf16>
    %47 = vector.shape_cast %46 : vector<1x8x8xbf16> to vector<8x8xbf16>
    %48 = vector.shape_cast %44 : vector<8x8xbf16> to vector<1x8x8xbf16>
    tpu.vector_store %arg4[%45, %c0_12, %c0_13], %48 {strides = array<i32>} : memref<4x16x8xbf16, #tpu.memory_space<vmem>>, vector<1x8x8xbf16>,
    %49 = vector.extract_strided_slice %40 {offsets = [8, 0], sizes = [8, 8], strides = [1, 1]} : vector<16x8xf32> to vector<8x8xf32>
    %50 = arith.truncf %49 : vector<8x8xf32> to vector<8x8xbf16>
    %51 = arith.index_cast %42 : i32 to index
    %c8 = arith.constant 8 : index
    %c0_14 = arith.constant 0 : index
    %52 = vector.load %arg4[%51, %c8, %c0_14] : memref<4x16x8xbf16, #tpu.memory_space<vmem>>, vector<1x8x8xbf16>
    %53 = vector.shape_cast %52 : vector<1x8x8xbf16> to vector<8x8xbf16>
    %54 = vector.shape_cast %50 : vector<8x8xbf16> to vector<1x8x8xbf16>
    tpu.vector_store %arg4[%51, %c8, %c0_14], %54 {strides = array<i32>} : memref<4x16x8xbf16, #tpu.memory_space<vmem>>, vector<1x8x8xbf16>,
    %c1_i32 = arith.constant 1 : i32
    %55 = arith.index_cast %c1_i32 : i32 to index
    %c0_15 = arith.constant 0 : index
    %c0_16 = arith.constant 0 : index
    %56 = vector.load %arg1[%55, %c0_15, %c0_16] : memref<4x48x8xbf16, #tpu.memory_space<vmem>>, vector<1x48x8xbf16>
    %57 = vector.shape_cast %56 : vector<1x48x8xbf16> to vector<48x8xbf16>
    %58 = arith.extf %57 : vector<48x8xbf16> to vector<48x8xf32>
    %59 = arith.truncf %40 : vector<16x8xf32> to vector<16x8xbf16>
    %cst_17 = arith.constant dense<0.000000e+00> : vector<48x8xf32>
    %60 = tpu.matmul %3, %59, %cst_17 {dimension_numbers = #tpu.dot_dimension_numbers<[1], [0], [0], [1], [0, 0, 1, 1], [], []>} : vector<48x16xbf16>, vector<16x8xbf16>, vector<48x8xf32> -> vector<48x8xf32>
    %61 = vector.extract_strided_slice %58 {offsets = [0, 0], sizes = [16, 8], strides = [1, 1]} : vector<48x8xf32> to vector<16x8xf32>
    %62 = vector.extract_strided_slice %60 {offsets = [0, 0], sizes = [16, 8], strides = [1, 1]} : vector<48x8xf32> to vector<16x8xf32>
    %63 = arith.addf %61, %62 : vector<16x8xf32>
    %64 = arith.negf %63 : vector<16x8xf32>
    %65 = math.exp %64 : vector<16x8xf32>
    %cst_18 = arith.constant 1.000000e+00 : f32
    %66 = vector.broadcast %cst_18 : f32 to vector<16x8xf32>
    %67 = arith.addf %66, %65 : vector<16x8xf32>
    %68 = arith.divf %66, %67 : vector<16x8xf32>
    %69 = vector.extract_strided_slice %58 {offsets = [16, 0], sizes = [16, 8], strides = [1, 1]} : vector<48x8xf32> to vector<16x8xf32>
    %70 = vector.extract_strided_slice %60 {offsets = [16, 0], sizes = [16, 8], strides = [1, 1]} : vector<48x8xf32> to vector<16x8xf32>
    %71 = arith.addf %69, %70 : vector<16x8xf32>
    %72 = arith.negf %71 : vector<16x8xf32>
    %73 = math.exp %72 : vector<16x8xf32>
    %cst_19 = arith.constant 1.000000e+00 : f32
    %74 = vector.broadcast %cst_19 : f32 to vector<16x8xf32>
    %75 = arith.addf %74, %73 : vector<16x8xf32>
    %76 = arith.divf %74, %75 : vector<16x8xf32>
    %77 = vector.extract_strided_slice %58 {offsets = [32, 0], sizes = [16, 8], strides = [1, 1]} : vector<48x8xf32> to vector<16x8xf32>
    %78 = vector.extract_strided_slice %60 {offsets = [32, 0], sizes = [16, 8], strides = [1, 1]} : vector<48x8xf32> to vector<16x8xf32>
    %79 = vector.broadcast %4 : vector<16x1xf32> to vector<16x8xf32>
    %80 = arith.addf %78, %79 : vector<16x8xf32>
    %81 = arith.mulf %68, %80 : vector<16x8xf32>
    %82 = arith.addf %77, %81 : vector<16x8xf32>
    %83 = math.tanh %82 : vector<16x8xf32>
    %cst_20 = arith.constant 1.000000e+00 : f32
    %84 = vector.broadcast %cst_20 : f32 to vector<16x8xf32>
    %85 = arith.subf %84, %76 : vector<16x8xf32>
    %86 = arith.mulf %85, %83 : vector<16x8xf32>
    %87 = arith.mulf %76, %40 : vector<16x8xf32>
    %88 = arith.addf %86, %87 : vector<16x8xf32>
    %89 = arith.addi %5, %c1_i32 : i32
    %c3_i32_21 = arith.constant 3 : i32
    %90 = arith.subi %c3_i32_21, %89 : i32
    %91 = vector.extract_strided_slice %88 {offsets = [0, 0], sizes = [8, 8], strides = [1, 1]} : vector<16x8xf32> to vector<8x8xf32>
    %92 = arith.truncf %91 : vector<8x8xf32> to vector<8x8xbf16>
    %93 = arith.index_cast %89 : i32 to index
    %c0_22 = arith.constant 0 : index
    %c0_23 = arith.constant 0 : index
    %94 = vector.load %arg4[%93, %c0_22, %c0_23] : memref<4x16x8xbf16, #tpu.memory_space<vmem>>, vector<1x8x8xbf16>
    %95 = vector.shape_cast %94 : vector<1x8x8xbf16> to vector<8x8xbf16>
    %96 = vector.shape_cast %92 : vector<8x8xbf16> to vector<1x8x8xbf16>
    tpu.vector_store %arg4[%93, %c0_22, %c0_23], %96 {strides = array<i32>} : memref<4x16x8xbf16, #tpu.memory_space<vmem>>, vector<1x8x8xbf16>,
    %97 = vector.extract_strided_slice %88 {offsets = [8, 0], sizes = [8, 8], strides = [1, 1]} : vector<16x8xf32> to vector<8x8xf32>
    %98 = arith.truncf %97 : vector<8x8xf32> to vector<8x8xbf16>
    %99 = arith.index_cast %90 : i32 to index
    %c8_24 = arith.constant 8 : index
    %c0_25 = arith.constant 0 : index
    %100 = vector.load %arg4[%99, %c8_24, %c0_25] : memref<4x16x8xbf16, #tpu.memory_space<vmem>>, vector<1x8x8xbf16>
    %101 = vector.shape_cast %100 : vector<1x8x8xbf16> to vector<8x8xbf16>
    %102 = vector.shape_cast %98 : vector<8x8xbf16> to vector<1x8x8xbf16>
    tpu.vector_store %arg4[%99, %c8_24, %c0_25], %102 {strides = array<i32>} : memref<4x16x8xbf16, #tpu.memory_space<vmem>>, vector<1x8x8xbf16>,
    %c2_i32 = arith.constant 2 : i32
    %103 = arith.index_cast %c2_i32 : i32 to index
    %c0_26 = arith.constant 0 : index
    %c0_27 = arith.constant 0 : index
    %104 = vector.load %arg1[%103, %c0_26, %c0_27] : memref<4x48x8xbf16, #tpu.memory_space<vmem>>, vector<1x48x8xbf16>
    %105 = vector.shape_cast %104 : vector<1x48x8xbf16> to vector<48x8xbf16>
    %106 = arith.extf %105 : vector<48x8xbf16> to vector<48x8xf32>
    %107 = arith.truncf %88 : vector<16x8xf32> to vector<16x8xbf16>
    %cst_28 = arith.constant dense<0.000000e+00> : vector<48x8xf32>
    %108 = tpu.matmul %3, %107, %cst_28 {dimension_numbers = #tpu.dot_dimension_numbers<[1], [0], [0], [1], [0, 0, 1, 1], [], []>} : vector<48x16xbf16>, vector<16x8xbf16>, vector<48x8xf32> -> vector<48x8xf32>
    %109 = vector.extract_strided_slice %106 {offsets = [0, 0], sizes = [16, 8], strides = [1, 1]} : vector<48x8xf32> to vector<16x8xf32>
    %110 = vector.extract_strided_slice %108 {offsets = [0, 0], sizes = [16, 8], strides = [1, 1]} : vector<48x8xf32> to vector<16x8xf32>
    %111 = arith.addf %109, %110 : vector<16x8xf32>
    %112 = arith.negf %111 : vector<16x8xf32>
    %113 = math.exp %112 : vector<16x8xf32>
    %cst_29 = arith.constant 1.000000e+00 : f32
    %114 = vector.broadcast %cst_29 : f32 to vector<16x8xf32>
    %115 = arith.addf %114, %113 : vector<16x8xf32>
    %116 = arith.divf %114, %115 : vector<16x8xf32>
    %117 = vector.extract_strided_slice %106 {offsets = [16, 0], sizes = [16, 8], strides = [1, 1]} : vector<48x8xf32> to vector<16x8xf32>
    %118 = vector.extract_strided_slice %108 {offsets = [16, 0], sizes = [16, 8], strides = [1, 1]} : vector<48x8xf32> to vector<16x8xf32>
    %119 = arith.addf %117, %118 : vector<16x8xf32>
    %120 = arith.negf %119 : vector<16x8xf32>
    %121 = math.exp %120 : vector<16x8xf32>
    %cst_30 = arith.constant 1.000000e+00 : f32
    %122 = vector.broadcast %cst_30 : f32 to vector<16x8xf32>
    %123 = arith.addf %122, %121 : vector<16x8xf32>
    %124 = arith.divf %122, %123 : vector<16x8xf32>
    %125 = vector.extract_strided_slice %106 {offsets = [32, 0], sizes = [16, 8], strides = [1, 1]} : vector<48x8xf32> to vector<16x8xf32>
    %126 = vector.extract_strided_slice %108 {offsets = [32, 0], sizes = [16, 8], strides = [1, 1]} : vector<48x8xf32> to vector<16x8xf32>
    %127 = vector.broadcast %4 : vector<16x1xf32> to vector<16x8xf32>
    %128 = arith.addf %126, %127 : vector<16x8xf32>
    %129 = arith.mulf %116, %128 : vector<16x8xf32>
    %130 = arith.addf %125, %129 : vector<16x8xf32>
    %131 = math.tanh %130 : vector<16x8xf32>
    %cst_31 = arith.constant 1.000000e+00 : f32
    %132 = vector.broadcast %cst_31 : f32 to vector<16x8xf32>
    %133 = arith.subf %132, %124 : vector<16x8xf32>
    %134 = arith.mulf %133, %131 : vector<16x8xf32>
    %135 = arith.mulf %124, %88 : vector<16x8xf32>
    %136 = arith.addf %134, %135 : vector<16x8xf32>
    %137 = arith.addi %5, %c2_i32 : i32
    %c3_i32_32 = arith.constant 3 : i32
    %138 = arith.subi %c3_i32_32, %137 : i32
    %139 = vector.extract_strided_slice %136 {offsets = [0, 0], sizes = [8, 8], strides = [1, 1]} : vector<16x8xf32> to vector<8x8xf32>
    %140 = arith.truncf %139 : vector<8x8xf32> to vector<8x8xbf16>
    %141 = arith.index_cast %137 : i32 to index
    %c0_33 = arith.constant 0 : index
    %c0_34 = arith.constant 0 : index
    %142 = vector.load %arg4[%141, %c0_33, %c0_34] : memref<4x16x8xbf16, #tpu.memory_space<vmem>>, vector<1x8x8xbf16>
    %143 = vector.shape_cast %142 : vector<1x8x8xbf16> to vector<8x8xbf16>
    %144 = vector.shape_cast %140 : vector<8x8xbf16> to vector<1x8x8xbf16>
    tpu.vector_store %arg4[%141, %c0_33, %c0_34], %144 {strides = array<i32>} : memref<4x16x8xbf16, #tpu.memory_space<vmem>>, vector<1x8x8xbf16>,
    %145 = vector.extract_strided_slice %136 {offsets = [8, 0], sizes = [8, 8], strides = [1, 1]} : vector<16x8xf32> to vector<8x8xf32>
    %146 = arith.truncf %145 : vector<8x8xf32> to vector<8x8xbf16>
    %147 = arith.index_cast %138 : i32 to index
    %c8_35 = arith.constant 8 : index
    %c0_36 = arith.constant 0 : index
    %148 = vector.load %arg4[%147, %c8_35, %c0_36] : memref<4x16x8xbf16, #tpu.memory_space<vmem>>, vector<1x8x8xbf16>
    %149 = vector.shape_cast %148 : vector<1x8x8xbf16> to vector<8x8xbf16>
    %150 = vector.shape_cast %146 : vector<8x8xbf16> to vector<1x8x8xbf16>
    tpu.vector_store %arg4[%147, %c8_35, %c0_36], %150 {strides = array<i32>} : memref<4x16x8xbf16, #tpu.memory_space<vmem>>, vector<1x8x8xbf16>,
    %c3_i32_37 = arith.constant 3 : i32
    %151 = arith.index_cast %c3_i32_37 : i32 to index
    %c0_38 = arith.constant 0 : index
    %c0_39 = arith.constant 0 : index
    %152 = vector.load %arg1[%151, %c0_38, %c0_39] : memref<4x48x8xbf16, #tpu.memory_space<vmem>>, vector<1x48x8xbf16>
    %153 = vector.shape_cast %152 : vector<1x48x8xbf16> to vector<48x8xbf16>
    %154 = arith.extf %153 : vector<48x8xbf16> to vector<48x8xf32>
    %155 = arith.truncf %136 : vector<16x8xf32> to vector<16x8xbf16>
    %cst_40 = arith.constant dense<0.000000e+00> : vector<48x8xf32>
    %156 = tpu.matmul %3, %155, %cst_40 {dimension_numbers = #tpu.dot_dimension_numbers<[1], [0], [0], [1], [0, 0, 1, 1], [], []>} : vector<48x16xbf16>, vector<16x8xbf16>, vector<48x8xf32> -> vector<48x8xf32>
    %157 = vector.extract_strided_slice %154 {offsets = [0, 0], sizes = [16, 8], strides = [1, 1]} : vector<48x8xf32> to vector<16x8xf32>
    %158 = vector.extract_strided_slice %156 {offsets = [0, 0], sizes = [16, 8], strides = [1, 1]} : vector<48x8xf32> to vector<16x8xf32>
    %159 = arith.addf %157, %158 : vector<16x8xf32>
    %160 = arith.negf %159 : vector<16x8xf32>
    %161 = math.exp %160 : vector<16x8xf32>
    %cst_41 = arith.constant 1.000000e+00 : f32
    %162 = vector.broadcast %cst_41 : f32 to vector<16x8xf32>
    %163 = arith.addf %162, %161 : vector<16x8xf32>
    %164 = arith.divf %162, %163 : vector<16x8xf32>
    %165 = vector.extract_strided_slice %154 {offsets = [16, 0], sizes = [16, 8], strides = [1, 1]} : vector<48x8xf32> to vector<16x8xf32>
    %166 = vector.extract_strided_slice %156 {offsets = [16, 0], sizes = [16, 8], strides = [1, 1]} : vector<48x8xf32> to vector<16x8xf32>
    %167 = arith.addf %165, %166 : vector<16x8xf32>
    %168 = arith.negf %167 : vector<16x8xf32>
    %169 = math.exp %168 : vector<16x8xf32>
    %cst_42 = arith.constant 1.000000e+00 : f32
    %170 = vector.broadcast %cst_42 : f32 to vector<16x8xf32>
    %171 = arith.addf %170, %169 : vector<16x8xf32>
    %172 = arith.divf %170, %171 : vector<16x8xf32>
    %173 = vector.extract_strided_slice %154 {offsets = [32, 0], sizes = [16, 8], strides = [1, 1]} : vector<48x8xf32> to vector<16x8xf32>
    %174 = vector.extract_strided_slice %156 {offsets = [32, 0], sizes = [16, 8], strides = [1, 1]} : vector<48x8xf32> to vector<16x8xf32>
    %175 = vector.broadcast %4 : vector<16x1xf32> to vector<16x8xf32>
    %176 = arith.addf %174, %175 : vector<16x8xf32>
    %177 = arith.mulf %164, %176 : vector<16x8xf32>
    %178 = arith.addf %173, %177 : vector<16x8xf32>
    %179 = math.tanh %178 : vector<16x8xf32>
    %cst_43 = arith.constant 1.000000e+00 : f32
    %180 = vector.broadcast %cst_43 : f32 to vector<16x8xf32>
    %181 = arith.subf %180, %172 : vector<16x8xf32>
    %182 = arith.mulf %181, %179 : vector<16x8xf32>
    %183 = arith.mulf %172, %136 : vector<16x8xf32>
    %184 = arith.addf %182, %183 : vector<16x8xf32>
    %185 = arith.addi %5, %c3_i32_37 : i32
    %c3_i32_44 = arith.constant 3 : i32
    %186 = arith.subi %c3_i32_44, %185 : i32
    %187 = vector.extract_strided_slice %184 {offsets = [0, 0], sizes = [8, 8], strides = [1, 1]} : vector<16x8xf32> to vector<8x8xf32>
    %188 = arith.truncf %187 : vector<8x8xf32> to vector<8x8xbf16>
    %189 = arith.index_cast %185 : i32 to index
    %c0_45 = arith.constant 0 : index
    %c0_46 = arith.constant 0 : index
    %190 = vector.load %arg4[%189, %c0_45, %c0_46] : memref<4x16x8xbf16, #tpu.memory_space<vmem>>, vector<1x8x8xbf16>
    %191 = vector.shape_cast %190 : vector<1x8x8xbf16> to vector<8x8xbf16>
    %192 = vector.shape_cast %188 : vector<8x8xbf16> to vector<1x8x8xbf16>
    tpu.vector_store %arg4[%189, %c0_45, %c0_46], %192 {strides = array<i32>} : memref<4x16x8xbf16, #tpu.memory_space<vmem>>, vector<1x8x8xbf16>,
    %193 = vector.extract_strided_slice %184 {offsets = [8, 0], sizes = [8, 8], strides = [1, 1]} : vector<16x8xf32> to vector<8x8xf32>
    %194 = arith.truncf %193 : vector<8x8xf32> to vector<8x8xbf16>
    %195 = arith.index_cast %186 : i32 to index
    %c8_47 = arith.constant 8 : index
    %c0_48 = arith.constant 0 : index
    %196 = vector.load %arg4[%195, %c8_47, %c0_48] : memref<4x16x8xbf16, #tpu.memory_space<vmem>>, vector<1x8x8xbf16>
    %197 = vector.shape_cast %196 : vector<1x8x8xbf16> to vector<8x8xbf16>
    %198 = vector.shape_cast %194 : vector<8x8xbf16> to vector<1x8x8xbf16>
    tpu.vector_store %arg4[%195, %c8_47, %c0_48], %198 {strides = array<i32>} : memref<4x16x8xbf16, #tpu.memory_space<vmem>>, vector<1x8x8xbf16>,
    %c4_i32_49 = arith.constant 4 : i32
    %c0_50 = arith.constant 0 : index
    %c0_51 = arith.constant 0 : index
    %199 = vector.load %arg5[%c0_50, %c0_51] : memref<16x8xf32, #tpu.memory_space<vmem>>, vector<16x8xf32>
    tpu.vector_store %arg5[%c0_50, %c0_51], %184 {strides = array<i32>} : memref<16x8xf32, #tpu.memory_space<vmem>>, vector<16x8xf32>,
    return
  }
  func.func @transform_0(%arg0: i32) -> (i32, i32, i32) {
    %c0_i32 = arith.constant 0 : i32
    %c0_i32_0 = arith.constant 0 : i32
    %c0_i32_1 = arith.constant 0 : i32
    return %arg0, %c0_i32, %c0_i32_0 : i32, i32, i32
  }
  func.func @transform_1(%arg0: i32) -> (i32, i32) {
    %c0_i32 = arith.constant 0 : i32
    %c0_i32_0 = arith.constant 0 : i32
    %c0_i32_1 = arith.constant 0 : i32
    return %c0_i32, %c0_i32_0 : i32, i32
  }
  func.func @transform_2(%arg0: i32) -> (i32, i32) {
    %c0_i32 = arith.constant 0 : i32
    %c0_i32_0 = arith.constant 0 : i32
    %c0_i32_1 = arith.constant 0 : i32
    return %c0_i32, %c0_i32_0 : i32, i32
  }
  func.func @transform_3(%arg0: i32) -> (i32, i32, i32) {
    %c0_i32 = arith.constant 0 : i32
    %c0_i32_0 = arith.constant 0 : i32
    %c0_i32_1 = arith.constant 0 : i32
    %c0_i32_2 = arith.constant 0 : i32
    return %c0_i32, %c0_i32_0, %c0_i32_1 : i32, i32, i32
  }
}

</mosaic_0001>

<bundles_post_ra>
// kernel: squeeze.5
= control target key start
LH: loop header
LB: loop body
LE: loop exit
PB: predicated region body
PF: predicated region fallthrough
CT: control target
= control target key end

     0   :  { %vm66_vm0 = vcmask 64512   ;;  %s483_s10 = smov 120   ;;  %v484_v23 = vmov 0.0   ;;  %s653_s0 = inlined_call_operand.vmem [shape: bf16[4,1,24,8], index: 0, kind: input, shape index: {}]   ;;  %s654_s1 = inlined_call_operand.vmem [shape: bf16[4,3,1,8,8], index: 1, kind: output, shape index: {}]  }
   0x1   :  { %v455_v0 = vld [vmem:[%s653_s0] sm:$0xff]   ;;  %v458_v1 = vld [vmem:[%s653_s0 + $0x8] sm:$0xff]   ;;  %s482_s0 = smov 112  }
   0x2   :  { %v456_v2 = vunpack.c.l.bf16 %v455_v0  ;;  %v457_v3 = vunpack.c.h.bf16 %v455_v0  ;;  %v452_v4 = vunpack.c.l.bf16 %v458_v1  ;;  %v453_v5 = vunpack.c.h.bf16 %v458_v1 }
   0x4   :  { %v472_v6 = vpack.i.bf16 %v457_v3, %v456_v2  ;;  %73 = vst.msk [vmem:[#allocation0 + $0x40] ss:$8 sm:$0xf] %vm66_vm0, %v457_v3   ;;  %75 = vst.msk [vmem:[#allocation0 + $0x40] ss:$8 sm:$0xf0] %vm66_vm0, %v457_v3   ;;  %v477_v7 = vpack.i.bf16 %v453_v5, %v452_v4 }
   0x5   :  { %67 = vst.msk [vmem:[#allocation0] ss:$8 sm:$0xf] %vm66_vm0, %v456_v2   ;;  %68 = vst.msk [vmem:[#allocation0] ss:$8 sm:$0xf0] %vm66_vm0, %v456_v2  }
   0x6   :  { %87 = vst.msk [vmem:[#allocation0 + $0xc0] ss:$8 sm:$0xf] %vm66_vm0, %v453_v5   ;;  %89 = vst.msk [vmem:[#allocation0 + $0xc0] ss:$8 sm:$0xf0] %vm66_vm0, %v453_v5   ;;  %473 = vrot.lane.b32.xlu1 %v472_v6, %s482_s0  ;;  %463 = vrot.lane.b32.xlu0 %v472_v6, %s483_s10 }
   0x7   :  { %80 = vst.msk [vmem:[#allocation0 + $0x80] ss:$8 sm:$0xf] %vm66_vm0, %v452_v4   ;;  %82 = vst.msk [vmem:[#allocation0 + $0x80] ss:$8 sm:$0xf0] %vm66_vm0, %v452_v4  }
   0xa   :  { %478 = vrot.lane.b32.xlu1 %v477_v7, %s482_s0  ;;  %468 = vrot.lane.b32.xlu0 %v477_v7, %s483_s10 }
  0x78   :  { %v474_v8 = vpop.permute.xlu1 %473  ;;  %v464_v9 = vpop.permute.xlu0 %463 }
  0x79   :  { %v476_v10 = vunpack.i.h.bf16 %v474_v8  ;;  %v475_v11 = vunpack.i.l.bf16 %v474_v8  ;;  %v466_v12 = vunpack.i.h.bf16 %v464_v9  ;;  %v465_v13 = vunpack.i.l.bf16 %v464_v9 }
  0x7b   :  { %139 = vst.msk [vmem:[#allocation0 + $0x42] ss:$8 sm:$0xf] %vm66_vm0, %v476_v10   ;;  %141 = vst.msk [vmem:[#allocation0 + $0x42] ss:$8 sm:$0xf0] %vm66_vm0, %v476_v10  }
  0x7c   :  { %130 = vst.msk [vmem:[#allocation0 + $0x2] ss:$8 sm:$0xf] %vm66_vm0, %v475_v11   ;;  %132 = vst.msk [vmem:[#allocation0 + $0x2] ss:$8 sm:$0xf0] %vm66_vm0, %v475_v11   ;;  %v479_v14 = vpop.permute.xlu1 %478  ;;  %v469_v15 = vpop.permute.xlu0 %468 }
  0x7d   :  { %104 = vst.msk [vmem:[#allocation0 + $0x41] ss:$8 sm:$0xf] %vm66_vm0, %v466_v12   ;;  %106 = vst.msk [vmem:[#allocation0 + $0x41] ss:$8 sm:$0xf0] %vm66_vm0, %v466_v12   ;;  %v481_v16 = vunpack.i.h.bf16 %v479_v14  ;;  %v480_v17 = vunpack.i.l.bf16 %v479_v14  ;;  %v471_v18 = vunpack.i.h.bf16 %v469_v15  ;;  %v470_v19 = vunpack.i.l.bf16 %v469_v15 }
  0x7e   :  { %95 = vst.msk [vmem:[#allocation0 + $0x1] ss:$8 sm:$0xf] %vm66_vm0, %v465_v13   ;;  %97 = vst.msk [vmem:[#allocation0 + $0x1] ss:$8 sm:$0xf0] %vm66_vm0, %v465_v13  }
  0x7f   :  { %157 = vst.msk [vmem:[#allocation0 + $0xc2] ss:$8 sm:$0xf] %vm66_vm0, %v481_v16   ;;  %159 = vst.msk [vmem:[#allocation0 + $0xc2] ss:$8 sm:$0xf0] %vm66_vm0, %v481_v16  }
  0x80   :  { %148 = vst.msk [vmem:[#allocation0 + $0x82] ss:$8 sm:$0xf] %vm66_vm0, %v480_v17   ;;  %150 = vst.msk [vmem:[#allocation0 + $0x82] ss:$8 sm:$0xf0] %vm66_vm0, %v480_v17  }
  0x81   :  { %122 = vst.msk [vmem:[#allocation0 + $0xc1] ss:$8 sm:$0xf] %vm66_vm0, %v471_v18   ;;  %124 = vst.msk [vmem:[#allocation0 + $0xc1] ss:$8 sm:$0xf0] %vm66_vm0, %v471_v18  }
  0x82   :  { %113 = vst.msk [vmem:[#allocation0 + $0x81] ss:$8 sm:$0xf] %vm66_vm0, %v470_v19   ;;  %115 = vst.msk [vmem:[#allocation0 + $0x81] ss:$8 sm:$0xf0] %vm66_vm0, %v470_v19  }
  0x84   :  { %v217_v20 = vld [vmem:[#allocation0 + $0x40] sm:$0xf]  ;;  %v224_v21 = vld [vmem:[#allocation0 + $0x48] sm:$0xf]  ;;  %v231_v22 = vld [vmem:[#allocation0 + $0x50] sm:$0xf] }
  0x85   :  { %v218_v24 = vpack.c.bf16 %v484_v23, %v217_v20  ;;  %v225_v25 = vpack.c.bf16 %v484_v23, %v224_v21  ;;  %v232_v26 = vpack.c.bf16 %v484_v23, %v231_v22  ;;  %v238_v27 = vld [vmem:[#allocation0 + $0x58] sm:$0xf]  ;;  %v245_v28 = vld [vmem:[#allocation0 + $0x60] sm:$0xf]  ;;  %v252_v29 = vld [vmem:[#allocation0 + $0x68] sm:$0xf] }
  0x86   :  { %v239_v30 = vpack.c.bf16 %v484_v23, %v238_v27  ;;  %v246_v31 = vpack.c.bf16 %v484_v23, %v245_v28  ;;  %v253_v32 = vpack.c.bf16 %v484_v23, %v252_v29  ;;  %v259_v33 = vld [vmem:[#allocation0 + $0x70] sm:$0xf]  ;;  %v266_v34 = vld [vmem:[#allocation0 + $0x78] sm:$0xf]  ;;  %v189_v35 = vld [vmem:[#allocation0 + $0x20] sm:$0xf] }
  0x87   :  { %426 = vst [vmem:[%s654_s1 + $0x10] sm:$0x3] %v218_v24  ;;  %427 = vst [vmem:[%s654_s1 + $0x12] sm:$0x3] %v225_v25  ;;  %v260_v36 = vpack.c.bf16 %v484_v23, %v259_v33  ;;  %v267_v37 = vpack.c.bf16 %v484_v23, %v266_v34  ;;  %v190_v38 = vpack.c.bf16 %v484_v23, %v189_v35  ;;  %v196_v39 = vld [vmem:[#allocation0 + $0x28] sm:$0xf] }
  0x88   :  { %428 = vst [vmem:[%s654_s1 + $0x14] sm:$0x3] %v232_v26  ;;  %v203_v40 = vld [vmem:[#allocation0 + $0x30] sm:$0xf]  ;;  %v210_v41 = vld [vmem:[#allocation0 + $0x38] sm:$0xf]  ;;  %v197_v42 = vpack.c.bf16 %v484_v23, %v196_v39 }
  0x89   :  { %429 = vst [vmem:[%s654_s1 + $0x16] sm:$0x3] %v239_v30  ;;  %430 = vst [vmem:[%s654_s1 + $0x18] sm:$0x3] %v246_v31  ;;  %v204_v43 = vpack.c.bf16 %v484_v23, %v203_v40  ;;  %v211_v44 = vpack.c.bf16 %v484_v23, %v210_v41  ;;  %v164_v45 = vld [vmem:[#allocation0] sm:$0xf] }
  0x8a   :  { %431 = vst [vmem:[%s654_s1 + $0x1a] sm:$0x3] %v253_v32  ;;  %v169_v46 = vld [vmem:[#allocation0 + $0x8] sm:$0xf]  ;;  %v175_v47 = vld [vmem:[#allocation0 + $0x10] sm:$0xf]  ;;  %v165_v49 = vpack.c.bf16 %v484_v23, %v164_v45 }
  0x8b   :  { %432 = vst [vmem:[%s654_s1 + $0x1c] sm:$0x3] %v260_v36  ;;  %433 = vst [vmem:[%s654_s1 + $0x1e] sm:$0x3] %v267_v37  ;;  %v182_v48 = vld [vmem:[#allocation0 + $0x18] sm:$0xf]  ;;  %v170_v50 = vpack.c.bf16 %v484_v23, %v169_v46  ;;  %v176_v51 = vpack.c.bf16 %v484_v23, %v175_v47 }
  0x8c   :  { %422 = vst [vmem:[%s654_s1 + $0x8] sm:$0x3] %v190_v38  ;;  %v329_v52 = vld [vmem:[#allocation0 + $0xc0] sm:$0xf]  ;;  %v336_v53 = vld [vmem:[#allocation0 + $0xc8] sm:$0xf]  ;;  %v183_v54 = vpack.c.bf16 %v484_v23, %v182_v48 }
  0x8d   :  { %423 = vst [vmem:[%s654_s1 + $0xa] sm:$0x3] %v197_v42  ;;  %424 = vst [vmem:[%s654_s1 + $0xc] sm:$0x3] %v204_v43  ;;  %v330_v55 = vpack.c.bf16 %v484_v23, %v329_v52  ;;  %v337_v56 = vpack.c.bf16 %v484_v23, %v336_v53  ;;  %v343_v57 = vld [vmem:[#allocation0 + $0xd0] sm:$0xf] }
  0x8e   :  { %425 = vst [vmem:[%s654_s1 + $0xe] sm:$0x3] %v211_v44  ;;  %v350_v58 = vld [vmem:[#allocation0 + $0xd8] sm:$0xf]  ;;  %v357_v59 = vld [vmem:[#allocation0 + $0xe0] sm:$0xf]  ;;  %v344_v60 = vpack.c.bf16 %v484_v23, %v343_v57 }
  0x8f   :  { %v351_v61 = vpack.c.bf16 %v484_v23, %v350_v58  ;;  %v358_v62 = vpack.c.bf16 %v484_v23, %v357_v59  ;;  %v364_v63 = vld [vmem:[#allocation0 + $0xe8] sm:$0xf]  ;;  %v371_v0 = vld [vmem:[#allocation0 + $0xf0] sm:$0xf]  ;;  %v378_v1 = vld [vmem:[#allocation0 + $0xf8] sm:$0xf] }
  0x90   :  { %167 = vst [vmem:[%s654_s1] sm:$0x3] %v165_v49  ;;  %419 = vst [vmem:[%s654_s1 + $0x2] sm:$0x3] %v170_v50  ;;  %v365_v2 = vpack.c.bf16 %v484_v23, %v364_v63  ;;  %v372_v3 = vpack.c.bf16 %v484_v23, %v371_v0  ;;  %v379_v4 = vpack.c.bf16 %v484_v23, %v378_v1  ;;  %v273_v5 = vld [vmem:[#allocation0 + $0x80] sm:$0xf] }
  0x91   :  { %420 = vst [vmem:[%s654_s1 + $0x4] sm:$0x3] %v176_v51  ;;  %442 = vst [vmem:[%s654_s1 + $0x30] sm:$0x3] %v330_v55  ;;  %v280_v6 = vld [vmem:[#allocation0 + $0x88] sm:$0xf]  ;;  %v274_v8 = vpack.c.bf16 %v484_v23, %v273_v5 }
  0x92   :  { %443 = vst [vmem:[%s654_s1 + $0x32] sm:$0x3] %v337_v56  ;;  %v287_v7 = vld [vmem:[#allocation0 + $0x90] sm:$0xf]  ;;  %421 = vst [vmem:[%s654_s1 + $0x6] sm:$0x3] %v183_v54  ;;  %v281_v9 = vpack.c.bf16 %v484_v23, %v280_v6 }
  0x93   :  { %444 = vst [vmem:[%s654_s1 + $0x34] sm:$0x3] %v344_v60  ;;  %445 = vst [vmem:[%s654_s1 + $0x36] sm:$0x3] %v351_v61  ;;  %v288_v10 = vpack.c.bf16 %v484_v23, %v287_v7  ;;  %v294_v11 = vld [vmem:[#allocation0 + $0x98] sm:$0xf] }
  0x94   :  { %446 = vst [vmem:[%s654_s1 + $0x38] sm:$0x3] %v358_v62  ;;  %v301_v12 = vld [vmem:[#allocation0 + $0xa0] sm:$0xf]  ;;  %v308_v13 = vld [vmem:[#allocation0 + $0xa8] sm:$0xf]  ;;  %v295_v14 = vpack.c.bf16 %v484_v23, %v294_v11 }
  0x95   :  { %447 = vst [vmem:[%s654_s1 + $0x3a] sm:$0x3] %v365_v2  ;;  %448 = vst [vmem:[%s654_s1 + $0x3c] sm:$0x3] %v372_v3  ;;  %v302_v15 = vpack.c.bf16 %v484_v23, %v301_v12  ;;  %v309_v16 = vpack.c.bf16 %v484_v23, %v308_v13  ;;  %v315_v17 = vld [vmem:[#allocation0 + $0xb0] sm:$0xf] }
  0x96   :  { %449 = vst [vmem:[%s654_s1 + $0x3e] sm:$0x3] %v379_v4  ;;  %v322_v18 = vld [vmem:[#allocation0 + $0xb8] sm:$0xf]  ;;  %434 = vst [vmem:[%s654_s1 + $0x20] sm:$0x3] %v274_v8  ;;  %v316_v19 = vpack.c.bf16 %v484_v23, %v315_v17 }
  0x97   :  { %435 = vst [vmem:[%s654_s1 + $0x22] sm:$0x3] %v281_v9  ;;  %436 = vst [vmem:[%s654_s1 + $0x24] sm:$0x3] %v288_v10  ;;  %v323_v20 = vpack.c.bf16 %v484_v23, %v322_v18 }
  0x98   :  { %437 = vst [vmem:[%s654_s1 + $0x26] sm:$0x3] %v295_v14  ;;  %438 = vst [vmem:[%s654_s1 + $0x28] sm:$0x3] %v302_v15 }
  0x99   :  { %439 = vst [vmem:[%s654_s1 + $0x2a] sm:$0x3] %v309_v16  ;;  %440 = vst [vmem:[%s654_s1 + $0x2c] sm:$0x3] %v316_v19 }
  0x9a   :  { %441 = vst [vmem:[%s654_s1 + $0x2e] sm:$0x3] %v323_v20 }

// kernel: squeeze.4
= control target key start
LH: loop header
LB: loop body
LE: loop exit
PB: predicated region body
PF: predicated region fallthrough
CT: control target
= control target key end

     0   :  { %vm66_vm0 = vcmask 64512   ;;  %s483_s10 = smov 120   ;;  %v484_v23 = vmov 0.0   ;;  %s653_s0 = inlined_call_operand.vmem [shape: bf16[4,1,24,8], index: 0, kind: input, shape index: {}]   ;;  %s654_s1 = inlined_call_operand.vmem [shape: bf16[4,3,1,8,8], index: 1, kind: output, shape index: {}]  }
   0x1   :  { %v455_v0 = vld [vmem:[%s653_s0] sm:$0xff]   ;;  %v458_v1 = vld [vmem:[%s653_s0 + $0x8] sm:$0xff]   ;;  %s482_s0 = smov 112  }
   0x2   :  { %v456_v2 = vunpack.c.l.bf16 %v455_v0  ;;  %v457_v3 = vunpack.c.h.bf16 %v455_v0  ;;  %v452_v4 = vunpack.c.l.bf16 %v458_v1  ;;  %v453_v5 = vunpack.c.h.bf16 %v458_v1 }
   0x4   :  { %v472_v6 = vpack.i.bf16 %v457_v3, %v456_v2  ;;  %73 = vst.msk [vmem:[#allocation0 + $0x40] ss:$8 sm:$0xf] %vm66_vm0, %v457_v3   ;;  %75 = vst.msk [vmem:[#allocation0 + $0x40] ss:$8 sm:$0xf0] %vm66_vm0, %v457_v3   ;;  %v477_v7 = vpack.i.bf16 %v453_v5, %v452_v4 }
   0x5   :  { %67 = vst.msk [vmem:[#allocation0] ss:$8 sm:$0xf] %vm66_vm0, %v456_v2   ;;  %68 = vst.msk [vmem:[#allocation0] ss:$8 sm:$0xf0] %vm66_vm0, %v456_v2  }
   0x6   :  { %87 = vst.msk [vmem:[#allocation0 + $0xc0] ss:$8 sm:$0xf] %vm66_vm0, %v453_v5   ;;  %89 = vst.msk [vmem:[#allocation0 + $0xc0] ss:$8 sm:$0xf0] %vm66_vm0, %v453_v5   ;;  %473 = vrot.lane.b32.xlu1 %v472_v6, %s482_s0  ;;  %463 = vrot.lane.b32.xlu0 %v472_v6, %s483_s10 }
   0x7   :  { %80 = vst.msk [vmem:[#allocation0 + $0x80] ss:$8 sm:$0xf] %vm66_vm0, %v452_v4   ;;  %82 = vst.msk [vmem:[#allocation0 + $0x80] ss:$8 sm:$0xf0] %vm66_vm0, %v452_v4  }
   0xa   :  { %478 = vrot.lane.b32.xlu1 %v477_v7, %s482_s0  ;;  %468 = vrot.lane.b32.xlu0 %v477_v7, %s483_s10 }
  0x78   :  { %v474_v8 = vpop.permute.xlu1 %473  ;;  %v464_v9 = vpop.permute.xlu0 %463 }
  0x79   :  { %v476_v10 = vunpack.i.h.bf16 %v474_v8  ;;  %v475_v11 = vunpack.i.l.bf16 %v474_v8  ;;  %v466_v12 = vunpack.i.h.bf16 %v464_v9  ;;  %v465_v13 = vunpack.i.l.bf16 %v464_v9 }
  0x7b   :  { %139 = vst.msk [vmem:[#allocation0 + $0x42] ss:$8 sm:$0xf] %vm66_vm0, %v476_v10   ;;  %141 = vst.msk [vmem:[#allocation0 + $0x42] ss:$8 sm:$0xf0] %vm66_vm0, %v476_v10  }
  0x7c   :  { %130 = vst.msk [vmem:[#allocation0 + $0x2] ss:$8 sm:$0xf] %vm66_vm0, %v475_v11   ;;  %132 = vst.msk [vmem:[#allocation0 + $0x2] ss:$8 sm:$0xf0] %vm66_vm0, %v475_v11   ;;  %v479_v14 = vpop.permute.xlu1 %478  ;;  %v469_v15 = vpop.permute.xlu0 %468 }
  0x7d   :  { %104 = vst.msk [vmem:[#allocation0 + $0x41] ss:$8 sm:$0xf] %vm66_vm0, %v466_v12   ;;  %106 = vst.msk [vmem:[#allocation0 + $0x41] ss:$8 sm:$0xf0] %vm66_vm0, %v466_v12   ;;  %v481_v16 = vunpack.i.h.bf16 %v479_v14  ;;  %v480_v17 = vunpack.i.l.bf16 %v479_v14  ;;  %v471_v18 = vunpack.i.h.bf16 %v469_v15  ;;  %v470_v19 = vunpack.i.l.bf16 %v469_v15 }
  0x7e   :  { %95 = vst.msk [vmem:[#allocation0 + $0x1] ss:$8 sm:$0xf] %vm66_vm0, %v465_v13   ;;  %97 = vst.msk [vmem:[#allocation0 + $0x1] ss:$8 sm:$0xf0] %vm66_vm0, %v465_v13  }
  0x7f   :  { %157 = vst.msk [vmem:[#allocation0 + $0xc2] ss:$8 sm:$0xf] %vm66_vm0, %v481_v16   ;;  %159 = vst.msk [vmem:[#allocation0 + $0xc2] ss:$8 sm:$0xf0] %vm66_vm0, %v481_v16  }
  0x80   :  { %148 = vst.msk [vmem:[#allocation0 + $0x82] ss:$8 sm:$0xf] %vm66_vm0, %v480_v17   ;;  %150 = vst.msk [vmem:[#allocation0 + $0x82] ss:$8 sm:$0xf0] %vm66_vm0, %v480_v17  }
  0x81   :  { %122 = vst.msk [vmem:[#allocation0 + $0xc1] ss:$8 sm:$0xf] %vm66_vm0, %v471_v18   ;;  %124 = vst.msk [vmem:[#allocation0 + $0xc1] ss:$8 sm:$0xf0] %vm66_vm0, %v471_v18  }
  0x82   :  { %113 = vst.msk [vmem:[#allocation0 + $0x81] ss:$8 sm:$0xf] %vm66_vm0, %v470_v19   ;;  %115 = vst.msk [vmem:[#allocation0 + $0x81] ss:$8 sm:$0xf0] %vm66_vm0, %v470_v19  }
  0x84   :  { %v217_v20 = vld [vmem:[#allocation0 + $0x40] sm:$0xf]  ;;  %v224_v21 = vld [vmem:[#allocation0 + $0x48] sm:$0xf]  ;;  %v231_v22 = vld [vmem:[#allocation0 + $0x50] sm:$0xf] }
  0x85   :  { %v218_v24 = vpack.c.bf16 %v484_v23, %v217_v20  ;;  %v225_v25 = vpack.c.bf16 %v484_v23, %v224_v21  ;;  %v232_v26 = vpack.c.bf16 %v484_v23, %v231_v22  ;;  %v238_v27 = vld [vmem:[#allocation0 + $0x58] sm:$0xf]  ;;  %v245_v28 = vld [vmem:[#allocation0 + $0x60] sm:$0xf]  ;;  %v252_v29 = vld [vmem:[#allocation0 + $0x68] sm:$0xf] }
  0x86   :  { %v239_v30 = vpack.c.bf16 %v484_v23, %v238_v27  ;;  %v246_v31 = vpack.c.bf16 %v484_v23, %v245_v28  ;;  %v253_v32 = vpack.c.bf16 %v484_v23, %v252_v29  ;;  %v259_v33 = vld [vmem:[#allocation0 + $0x70] sm:$0xf]  ;;  %v266_v34 = vld [vmem:[#allocation0 + $0x78] sm:$0xf]  ;;  %v189_v35 = vld [vmem:[#allocation0 + $0x20] sm:$0xf] }
  0x87   :  { %426 = vst [vmem:[%s654_s1 + $0x10] sm:$0x3] %v218_v24  ;;  %427 = vst [vmem:[%s654_s1 + $0x12] sm:$0x3] %v225_v25  ;;  %v260_v36 = vpack.c.bf16 %v484_v23, %v259_v33  ;;  %v267_v37 = vpack.c.bf16 %v484_v23, %v266_v34  ;;  %v190_v38 = vpack.c.bf16 %v484_v23, %v189_v35  ;;  %v196_v39 = vld [vmem:[#allocation0 + $0x28] sm:$0xf] }
  0x88   :  { %428 = vst [vmem:[%s654_s1 + $0x14] sm:$0x3] %v232_v26  ;;  %v203_v40 = vld [vmem:[#allocation0 + $0x30] sm:$0xf]  ;;  %v210_v41 = vld [vmem:[#allocation0 + $0x38] sm:$0xf]  ;;  %v197_v42 = vpack.c.bf16 %v484_v23, %v196_v39 }
  0x89   :  { %429 = vst [vmem:[%s654_s1 + $0x16] sm:$0x3] %v239_v30  ;;  %430 = vst [vmem:[%s654_s1 + $0x18] sm:$0x3] %v246_v31  ;;  %v204_v43 = vpack.c.bf16 %v484_v23, %v203_v40  ;;  %v211_v44 = vpack.c.bf16 %v484_v23, %v210_v41  ;;  %v164_v45 = vld [vmem:[#allocation0] sm:$0xf] }
  0x8a   :  { %431 = vst [vmem:[%s654_s1 + $0x1a] sm:$0x3] %v253_v32  ;;  %v169_v46 = vld [vmem:[#allocation0 + $0x8] sm:$0xf]  ;;  %v175_v47 = vld [vmem:[#allocation0 + $0x10] sm:$0xf]  ;;  %v165_v49 = vpack.c.bf16 %v484_v23, %v164_v45 }
  0x8b   :  { %432 = vst [vmem:[%s654_s1 + $0x1c] sm:$0x3] %v260_v36  ;;  %433 = vst [vmem:[%s654_s1 + $0x1e] sm:$0x3] %v267_v37  ;;  %v182_v48 = vld [vmem:[#allocation0 + $0x18] sm:$0xf]  ;;  %v170_v50 = vpack.c.bf16 %v484_v23, %v169_v46  ;;  %v176_v51 = vpack.c.bf16 %v484_v23, %v175_v47 }
  0x8c   :  { %422 = vst [vmem:[%s654_s1 + $0x8] sm:$0x3] %v190_v38  ;;  %v329_v52 = vld [vmem:[#allocation0 + $0xc0] sm:$0xf]  ;;  %v336_v53 = vld [vmem:[#allocation0 + $0xc8] sm:$0xf]  ;;  %v183_v54 = vpack.c.bf16 %v484_v23, %v182_v48 }
  0x8d   :  { %423 = vst [vmem:[%s654_s1 + $0xa] sm:$0x3] %v197_v42  ;;  %424 = vst [vmem:[%s654_s1 + $0xc] sm:$0x3] %v204_v43  ;;  %v330_v55 = vpack.c.bf16 %v484_v23, %v329_v52  ;;  %v337_v56 = vpack.c.bf16 %v484_v23, %v336_v53  ;;  %v343_v57 = vld [vmem:[#allocation0 + $0xd0] sm:$0xf] }
  0x8e   :  { %425 = vst [vmem:[%s654_s1 + $0xe] sm:$0x3] %v211_v44  ;;  %v350_v58 = vld [vmem:[#allocation0 + $0xd8] sm:$0xf]  ;;  %v357_v59 = vld [vmem:[#allocation0 + $0xe0] sm:$0xf]  ;;  %v344_v60 = vpack.c.bf16 %v484_v23, %v343_v57 }
  0x8f   :  { %v351_v61 = vpack.c.bf16 %v484_v23, %v350_v58  ;;  %v358_v62 = vpack.c.bf16 %v484_v23, %v357_v59  ;;  %v364_v63 = vld [vmem:[#allocation0 + $0xe8] sm:$0xf]  ;;  %v371_v0 = vld [vmem:[#allocation0 + $0xf0] sm:$0xf]  ;;  %v378_v1 = vld [vmem:[#allocation0 + $0xf8] sm:$0xf] }
  0x90   :  { %167 = vst [vmem:[%s654_s1] sm:$0x3] %v165_v49  ;;  %419 = vst [vmem:[%s654_s1 + $0x2] sm:$0x3] %v170_v50  ;;  %v365_v2 = vpack.c.bf16 %v484_v23, %v364_v63  ;;  %v372_v3 = vpack.c.bf16 %v484_v23, %v371_v0  ;;  %v379_v4 = vpack.c.bf16 %v484_v23, %v378_v1  ;;  %v273_v5 = vld [vmem:[#allocation0 + $0x80] sm:$0xf] }
  0x91   :  { %420 = vst [vmem:[%s654_s1 + $0x4] sm:$0x3] %v176_v51  ;;  %442 = vst [vmem:[%s654_s1 + $0x30] sm:$0x3] %v330_v55  ;;  %v280_v6 = vld [vmem:[#allocation0 + $0x88] sm:$0xf]  ;;  %v274_v8 = vpack.c.bf16 %v484_v23, %v273_v5 }
  0x92   :  { %443 = vst [vmem:[%s654_s1 + $0x32] sm:$0x3] %v337_v56  ;;  %v287_v7 = vld [vmem:[#allocation0 + $0x90] sm:$0xf]  ;;  %421 = vst [vmem:[%s654_s1 + $0x6] sm:$0x3] %v183_v54  ;;  %v281_v9 = vpack.c.bf16 %v484_v23, %v280_v6 }
  0x93   :  { %444 = vst [vmem:[%s654_s1 + $0x34] sm:$0x3] %v344_v60  ;;  %445 = vst [vmem:[%s654_s1 + $0x36] sm:$0x3] %v351_v61  ;;  %v288_v10 = vpack.c.bf16 %v484_v23, %v287_v7  ;;  %v294_v11 = vld [vmem:[#allocation0 + $0x98] sm:$0xf] }
  0x94   :  { %446 = vst [vmem:[%s654_s1 + $0x38] sm:$0x3] %v358_v62  ;;  %v301_v12 = vld [vmem:[#allocation0 + $0xa0] sm:$0xf]  ;;  %v308_v13 = vld [vmem:[#allocation0 + $0xa8] sm:$0xf]  ;;  %v295_v14 = vpack.c.bf16 %v484_v23, %v294_v11 }
  0x95   :  { %447 = vst [vmem:[%s654_s1 + $0x3a] sm:$0x3] %v365_v2  ;;  %448 = vst [vmem:[%s654_s1 + $0x3c] sm:$0x3] %v372_v3  ;;  %v302_v15 = vpack.c.bf16 %v484_v23, %v301_v12  ;;  %v309_v16 = vpack.c.bf16 %v484_v23, %v308_v13  ;;  %v315_v17 = vld [vmem:[#allocation0 + $0xb0] sm:$0xf] }
  0x96   :  { %449 = vst [vmem:[%s654_s1 + $0x3e] sm:$0x3] %v379_v4  ;;  %v322_v18 = vld [vmem:[#allocation0 + $0xb8] sm:$0xf]  ;;  %434 = vst [vmem:[%s654_s1 + $0x20] sm:$0x3] %v274_v8  ;;  %v316_v19 = vpack.c.bf16 %v484_v23, %v315_v17 }
  0x97   :  { %435 = vst [vmem:[%s654_s1 + $0x22] sm:$0x3] %v281_v9  ;;  %436 = vst [vmem:[%s654_s1 + $0x24] sm:$0x3] %v288_v10  ;;  %v323_v20 = vpack.c.bf16 %v484_v23, %v322_v18 }
  0x98   :  { %437 = vst [vmem:[%s654_s1 + $0x26] sm:$0x3] %v295_v14  ;;  %438 = vst [vmem:[%s654_s1 + $0x28] sm:$0x3] %v302_v15 }
  0x99   :  { %439 = vst [vmem:[%s654_s1 + $0x2a] sm:$0x3] %v309_v16  ;;  %440 = vst [vmem:[%s654_s1 + $0x2c] sm:$0x3] %v316_v19 }
  0x9a   :  { %441 = vst [vmem:[%s654_s1 + $0x2e] sm:$0x3] %v323_v20 }

// kernel: patch_unified_forward.4
= control target key start
LH: loop header
LB: loop body
LE: loop exit
PB: predicated region body
PF: predicated region fallthrough
CT: control target
= control target key end

     0   :  { %vm19_vm0 = vcmask 64512   ;;  %v871_v0 = vmov 0.0   ;;  %vm872_vm1 = vmmov 0   ;;  %v873_v1 = vmov 0   ;;  %s1097_s1 = inlined_call_operand.vmem [shape: bf16[48,16], index: 1, kind: input, shape index: {}]   ;;  %s1098_s2 = inlined_call_operand.vmem [shape: f32[16,1], index: 2, kind: input, shape index: {}]   ;;  %s1099_s0 = inlined_call_operand.vmem [shape: bf16[4,48,8], index: 0, kind: input, shape index: {}]   ;;  %s1100_s3 = inlined_call_operand.vmem [shape: bf16[4,16,8], index: 3, kind: output, shape index: {}]  }
   0x1   :  { %728 = vmatprep.subr.bf16.mxu0 %v871_v0  ;;  %20 = vst.msk [vmem:[#allocation2] sm:$0xff] %vm19_vm0, %v871_v0  ;;  %21 = vst.msk [vmem:[#allocation2 + $0x8] sm:$0xff] %vm19_vm0, %v871_v0  ;;  %730 = vmatprep.mubr.msk.bf16.mxu0 %vm872_vm1, %v871_v0  ;;  %v28_v2 = vld [vmem:[%s1098_s2] sm:$0xff]  ;;  %v29_v3 = vld [vmem:[%s1098_s2 + $0x8] sm:$0xff]  ;;  %vm61_vm2 = vcmask 130048   ;;  %vm186_vm3 = vcmask 60416  }
   0x2   :  { %787 = vset.pattern.permute.xlu0 %v873_v1  ;;  %742 = vmatprep.subr.bf16.mxu1 %v871_v0  ;;  %v919_v7 = vld [vmem:[%s1097_s1] sm:$0xff]   ;;  %v929_v8 = vld [vmem:[%s1097_s1 + $0x8] sm:$0xff]   ;;  %v938_v9 = vld [vmem:[%s1097_s1 + $0x10] sm:$0xff]   ;;  %vm194_vm4 = vcmask 64516  }
   0x3   :  { %744 = vmatprep.mubr.msk.bf16.mxu1 %vm872_vm1, %v871_v0  ;;  %158 = vperm.xlu0 %787, %v28_v2   ;;  %v654_v10 = vld [vmem:[%s1099_s0] sm:$0xff]   ;;  %v701_v17 = vld [vmem:[%s1099_s0 + $0x8] sm:$0xff]   ;;  %v702_v43 = vld [vmem:[%s1099_s0 + $0x10] sm:$0xff]  }
   0x4   :  { %v655_v11 = vunpack.c.l.bf16 %v654_v10  ;;  %v656_v12 = vunpack.c.h.bf16 %v654_v10  ;;  %v659_v22 = vunpack.c.l.bf16 %v701_v17  ;;  %v660_v23 = vunpack.c.h.bf16 %v701_v17 }
   0x5   :  { %v663_v47 = vunpack.c.l.bf16 %v702_v43  ;;  %v664_v51 = vunpack.c.h.bf16 %v702_v43 }
   0x7   :  { %163 = vperm.xlu0 %787, %v29_v3  }
   0x8   :  { %v910_v4 = vld [vmem:[#allocation2] sm:$0xff]  ;;  %v912_v5 = vld [vmem:[#allocation2 + $0x8] sm:$0xff] }
   0x9   :  { %v45_v6 = vpack.c.bf16 %v912_v5, %v910_v4 }
   0xb   :  { %729 = vmatpush3.bf16.msra.mxu0 %v45_v6 }
   0xc   :  { %756 = vmatprep.subr.bf16.mxu0 %v871_v0 }
   0xe   :  { %731 = vmatmul.mubr.msk.bf16.vlgmr.msra.gmra.mrb[0].mxu0 %vm61_vm2, %v919_v7 }
   0xf   :  { %734 = vmatprep.mubr.msk.bf16.mxu0 %vm872_vm1, %v871_v0 }
  0x16   :  { %735 = vmatmul.mubr.msk.bf16.gmra.mrb[4].mxu0 %vm61_vm2, %v929_v8 }
  0x17   :  { %738 = vmatprep.mubr.msk.bf16.mxu0 %vm872_vm1, %v871_v0 }
  0x1e   :  { %739 = vmatmul.mubr.msk.bf16.gmra.mrb[8].mxu0 %vm61_vm2, %v938_v9 }
  0x1f   :  { %758 = vmatprep.mubr.msk.bf16.mxu0 %vm872_vm1, %v871_v0 }
  0x82   :  { %v950_v40 = vpop.permute.xlu0 %158 }
  0x86   :  { %v955_v45 = vpop.permute.xlu0 %163 }
  0xe1   :  { %v105_v13 = vpop.f32.mrb[0].mxu0 }
  0xe2   :  { %v128_v14 = vadd.f32 %v655_v11, %v105_v13  ;;  %v732_v15 = vpop.f32.mrb[1].mxu0  ;;  %v703_v13 = vld [vmem:[%s1099_s0 + $0x18] sm:$0xff]  }
  0xe3   :  { %v108_v16 = vpop.f32.mrb[2].mxu0  ;;  %v668_v15 = vunpack.c.h.bf16 %v703_v13 }
  0xe4   :  { %v604_v18 = vmul.f32 -1.442695, %v128_v14  ;;  %v129_v19 = vadd.f32 %v656_v12, %v108_v16  ;;  %v733_v20 = vpop.f32.mrb[3].mxu0  ;;  %v667_v14 = vunpack.c.l.bf16 %v703_v13 }
  0xe5   :  { %v704_v20 = vld [vmem:[%s1099_s0 + $0x20] sm:$0xff]  }
  0xe6   :  { %791 = vpow2.f32 %v604_v18  ;;  %v605_v21 = vmul.f32 -1.442695, %v129_v19 }
  0xe8   :  { %793 = vpow2.f32 %v605_v21 }
  0xe9   :  { %v113_v24 = vpop.f32.mrb[4].mxu0 }
  0xea   :  { %v142_v25 = vadd.f32 %v659_v22, %v113_v24  ;;  %v736_v26 = vpop.f32.mrb[5].mxu0 }
  0xeb   :  { %v116_v27 = vpop.f32.mrb[6].mxu0  ;;  %v672_v26 = vunpack.c.h.bf16 %v704_v20 }
  0xec   :  { %v606_v28 = vmul.f32 -1.442695, %v142_v25  ;;  %v143_v29 = vadd.f32 %v660_v23, %v116_v27  ;;  %v737_v30 = vpop.f32.mrb[7].mxu0  ;;  %v671_v25 = vunpack.c.l.bf16 %v704_v20 }
  0xee   :  { %795 = vpow2.f32 %v606_v28  ;;  %v607_v31 = vmul.f32 -1.442695, %v143_v29 }
  0xf0   :  { %v792_v32 = vpop.eup %791  ;;  %797 = vpow2.f32 %v607_v31 }
  0xf1   :  { %v136_v33 = vadd.f32 1.0, %v792_v32  ;;  %v121_v34 = vpop.f32.mrb[8].mxu0 }
  0xf2   :  { %v794_v35 = vpop.eup %793  ;;  %v740_v36 = vpop.f32.mrb[9].mxu0  ;;  %v166_v48 = vadd.f32 %v950_v40, %v121_v34 }
  0xf3   :  { %799 = vrcp.f32 %v136_v33  ;;  %v137_v37 = vadd.f32 1.0, %v794_v35  ;;  %v124_v38 = vpop.f32.mrb[10].mxu0 }
  0xf4   :  { %v741_v39 = vpop.f32.mrb[11].mxu0  ;;  %v167_v52 = vadd.f32 %v955_v45, %v124_v38 }
  0xf5   :  { %801 = vrcp.f32 %v137_v37 }
  0xf8   :  { %v796_v41 = vpop.eup %795 }
  0xf9   :  { %v150_v42 = vadd.f32 1.0, %v796_v41 }
  0xfa   :  { %v798_v44 = vpop.eup %797 }
  0xfb   :  { %803 = vrcp.f32 %v150_v42  ;;  %v151_v46 = vadd.f32 1.0, %v798_v44 }
  0xfd   :  { %v800_v49 = vpop.eup %799  ;;  %805 = vrcp.f32 %v151_v46  ;;  %v705_v46 = vld [vmem:[%s1099_s0 + $0x28] sm:$0xff]  }
  0xfe   :  { %v168_v50 = vmul.f32 %v800_v49, %v166_v48  ;;  %v675_v49 = vunpack.c.l.bf16 %v705_v46 }
  0xff   :  { %v802_v53 = vpop.eup %801 }
 0x100   :  { %v170_v54 = vadd.f32 %v663_v47, %v168_v50  ;;  %v169_v55 = vmul.f32 %v802_v53, %v167_v52 }
 0x102   :  { %807 = vtanh.f32 %v170_v54  ;;  %v171_v56 = vadd.f32 %v664_v51, %v169_v55  ;;  %v676_v54 = vunpack.c.h.bf16 %v705_v46 }
 0x104   :  { %809 = vtanh.f32 %v171_v56 }
 0x105   :  { %v804_v57 = vpop.eup %803 }
 0x106   :  { %v174_v58 = vsub.f32 1.0, %v804_v57  ;;  %v178_v63 = vmul.f32 %v804_v57, %v910_v4 }
 0x107   :  { %v806_v59 = vpop.eup %805 }
 0x108   :  { %v175_v61 = vsub.f32 1.0, %v806_v59  ;;  %v179_v3 = vmul.f32 %v806_v59, %v912_v5 }
 0x10c   :  { %v808_v60 = vpop.eup %807 }
 0x10d   :  { %v176_v62 = vmul.f32 %v808_v60, %v174_v58 }
 0x10e   :  { %v810_v1 = vpop.eup %809 }
 0x10f   :  { %v177_v2 = vmul.f32 %v810_v1, %v175_v61  ;;  %v961_v6 = vadd.f32 %v178_v63, %v176_v62 }
 0x111   :  { %v963_v10 = vadd.f32 %v179_v3, %v177_v2  ;;  %v183_v11 = vpack.c.bf16 %v961_v6, %v961_v6 }
 0x113   :  { %187 = vst.msk [vmem:[%s1100_s3] sm:$0xf] %vm186_vm3, %v183_v11  ;;  %v188_v4 = vpack.c.bf16 %v963_v10, %v963_v10  ;;  %v209_v12 = vpack.c.bf16 %v963_v10, %v961_v6 }
 0x115   :  { %v190_v5 = vrot.slane %v188_v4, 4  ;;  %743 = vmatpush3.bf16.msra.mxu1 %v209_v12 }
 0x116   :  { %770 = vmatprep.subr.bf16.mxu1 %v871_v0 }
 0x117   :  { %608 = vst.msk [vmem:[%s1100_s3 + $0x18] sm:$0xf0] %vm194_vm4, %v190_v5 }
 0x118   :  { %745 = vmatmul.mubr.msk.bf16.vlgmr.msra.gmra.mrb[0].mxu1 %vm61_vm2, %v919_v7 }
 0x119   :  { %748 = vmatprep.mubr.msk.bf16.mxu1 %vm872_vm1, %v871_v0 }
 0x120   :  { %749 = vmatmul.mubr.msk.bf16.gmra.mrb[4].mxu1 %vm61_vm2, %v929_v8 }
 0x121   :  { %752 = vmatprep.mubr.msk.bf16.mxu1 %vm872_vm1, %v871_v0 }
 0x128   :  { %753 = vmatmul.mubr.msk.bf16.gmra.mrb[8].mxu1 %vm61_vm2, %v938_v9 }
 0x129   :  { %772 = vmatprep.mubr.msk.bf16.mxu1 %vm872_vm1, %v871_v0 }
 0x1eb   :  { %v244_v16 = vpop.f32.mrb[0].mxu1 }
 0x1ec   :  { %v267_v17 = vadd.f32 %v667_v14, %v244_v16  ;;  %v746_v18 = vpop.f32.mrb[1].mxu1 }
 0x1ed   :  { %v247_v19 = vpop.f32.mrb[2].mxu1 }
 0x1ee   :  { %v618_v21 = vmul.f32 -1.442695, %v267_v17  ;;  %v268_v22 = vadd.f32 %v668_v15, %v247_v19  ;;  %v747_v23 = vpop.f32.mrb[3].mxu1 }
 0x1ef   :  { %v707_v23 = vld [vmem:[%s1099_s0 + $0x38] sm:$0xff]  }
 0x1f0   :  { %811 = vpow2.f32 %v618_v21  ;;  %v619_v24 = vmul.f32 -1.442695, %v268_v22 }
 0x1f2   :  { %813 = vpow2.f32 %v619_v24 }
 0x1f3   :  { %v252_v27 = vpop.f32.mrb[4].mxu1 }
 0x1f4   :  { %v281_v28 = vadd.f32 %v671_v25, %v252_v27  ;;  %v750_v29 = vpop.f32.mrb[5].mxu1 }
 0x1f5   :  { %v255_v30 = vpop.f32.mrb[6].mxu1  ;;  %v684_v29 = vunpack.c.h.bf16 %v707_v23 }
 0x1f6   :  { %v620_v31 = vmul.f32 -1.442695, %v281_v28  ;;  %v282_v32 = vadd.f32 %v672_v26, %v255_v30  ;;  %v751_v33 = vpop.f32.mrb[7].mxu1  ;;  %v683_v28 = vunpack.c.l.bf16 %v707_v23 }
 0x1f8   :  { %815 = vpow2.f32 %v620_v31  ;;  %v621_v34 = vmul.f32 -1.442695, %v282_v32 }
 0x1fa   :  { %v812_v35 = vpop.eup %811  ;;  %817 = vpow2.f32 %v621_v34 }
 0x1fb   :  { %v275_v36 = vadd.f32 1.0, %v812_v35  ;;  %v260_v37 = vpop.f32.mrb[8].mxu1 }
 0x1fc   :  { %v814_v38 = vpop.eup %813  ;;  %v754_v39 = vpop.f32.mrb[9].mxu1  ;;  %v295_v50 = vadd.f32 %v260_v37, %v950_v40 }
 0x1fd   :  { %819 = vrcp.f32 %v275_v36  ;;  %v276_v41 = vadd.f32 1.0, %v814_v38  ;;  %v263_v42 = vpop.f32.mrb[10].mxu1 }
 0x1fe   :  { %v755_v43 = vpop.f32.mrb[11].mxu1  ;;  %v296_v55 = vadd.f32 %v263_v42, %v955_v45 }
 0x1ff   :  { %821 = vrcp.f32 %v276_v41 }
 0x202   :  { %v816_v44 = vpop.eup %815 }
 0x203   :  { %v289_v48 = vadd.f32 1.0, %v816_v44 }
 0x204   :  { %v818_v47 = vpop.eup %817 }
 0x205   :  { %v290_v52 = vadd.f32 1.0, %v818_v47  ;;  %823 = vrcp.f32 %v289_v48 }
 0x207   :  { %v820_v51 = vpop.eup %819  ;;  %825 = vrcp.f32 %v290_v52 }
 0x208   :  { %v297_v53 = vmul.f32 %v820_v51, %v295_v50 }
 0x209   :  { %v822_v56 = vpop.eup %821 }
 0x20a   :  { %v299_v57 = vadd.f32 %v675_v49, %v297_v53  ;;  %v298_v58 = vmul.f32 %v822_v56, %v296_v55  ;;  %v708_v49 = vld [vmem:[%s1099_s0 + $0x40] sm:$0xff]  }
 0x20b   :  { %v687_v52 = vunpack.c.l.bf16 %v708_v49 }
 0x20c   :  { %827 = vtanh.f32 %v299_v57  ;;  %v300_v59 = vadd.f32 %v676_v54, %v298_v58  ;;  %v688_v57 = vunpack.c.h.bf16 %v708_v49 }
 0x20e   :  { %829 = vtanh.f32 %v300_v59 }
 0x20f   :  { %v824_v60 = vpop.eup %823 }
 0x210   :  { %v303_v61 = vsub.f32 1.0, %v824_v60  ;;  %v307_v3 = vmul.f32 %v824_v60, %v961_v6 }
 0x211   :  { %v826_v62 = vpop.eup %825 }
 0x212   :  { %v304_v1 = vsub.f32 1.0, %v826_v62  ;;  %v308_v12 = vmul.f32 %v826_v62, %v963_v10  ;;  %v706_v10 = vld [vmem:[%s1099_s0 + $0x30] sm:$0xff]  }
 0x213   :  { %v679_v17 = vunpack.c.l.bf16 %v706_v10  ;;  %v680_v18 = vunpack.c.h.bf16 %v706_v10 }
 0x216   :  { %v828_v63 = vpop.eup %827 }
 0x217   :  { %v305_v2 = vmul.f32 %v828_v63, %v303_v61 }
 0x218   :  { %v830_v11 = vpop.eup %829 }
 0x219   :  { %v306_v4 = vmul.f32 %v830_v11, %v304_v1  ;;  %v1005_v5 = vadd.f32 %v307_v3, %v305_v2 }
 0x21b   :  { %v1007_v13 = vadd.f32 %v308_v12, %v306_v4  ;;  %v313_v14 = vpack.c.bf16 %v1005_v5, %v1005_v5 }
 0x21d   :  { %622 = vst.msk [vmem:[%s1100_s3 + $0x8] sm:$0xf] %vm186_vm3, %v313_v14  ;;  %v317_v15 = vpack.c.bf16 %v1007_v13, %v1007_v13  ;;  %v337_v6 = vpack.c.bf16 %v1007_v13, %v1005_v5 }
 0x21f   :  { %v319_v16 = vrot.slane %v317_v15, 4  ;;  %757 = vmatpush3.bf16.msra.mxu0 %v337_v6 }
 0x221   :  { %623 = vst.msk [vmem:[%s1100_s3 + $0x10] sm:$0xf0] %vm194_vm4, %v319_v16 }
 0x222   :  { %759 = vmatmul.mubr.msk.bf16.vlgmr.msra.gmra.mrb[12].mxu0 %vm61_vm2, %v919_v7 }
 0x223   :  { %762 = vmatprep.mubr.msk.bf16.mxu0 %vm872_vm1, %v871_v0 }
 0x22a   :  { %763 = vmatmul.mubr.msk.bf16.gmra.mrb[16].mxu0 %vm61_vm2, %v929_v8 }
 0x22b   :  { %766 = vmatprep.mubr.msk.bf16.mxu0 %vm872_vm1, %v871_v0 }
 0x232   :  { %767 = vmatmul.mubr.msk.bf16.gmra.mrb[20].mxu0 %vm61_vm2, %v938_v9 }
 0x2f5   :  { %v372_v19 = vpop.f32.mrb[12].mxu0 }
 0x2f6   :  { %v395_v20 = vadd.f32 %v679_v17, %v372_v19  ;;  %v760_v21 = vpop.f32.mrb[13].mxu0 }
 0x2f7   :  { %v375_v22 = vpop.f32.mrb[14].mxu0 }
 0x2f8   :  { %v633_v24 = vmul.f32 -1.442695, %v395_v20  ;;  %v396_v25 = vadd.f32 %v680_v18, %v375_v22  ;;  %v761_v26 = vpop.f32.mrb[15].mxu0 }
 0x2fa   :  { %831 = vpow2.f32 %v633_v24  ;;  %v634_v27 = vmul.f32 -1.442695, %v396_v25 }
 0x2fc   :  { %833 = vpow2.f32 %v634_v27 }
 0x2fd   :  { %v380_v30 = vpop.f32.mrb[16].mxu0 }
 0x2fe   :  { %v409_v31 = vadd.f32 %v683_v28, %v380_v30  ;;  %v764_v32 = vpop.f32.mrb[17].mxu0 }
 0x2ff   :  { %v383_v33 = vpop.f32.mrb[18].mxu0 }
 0x300   :  { %v635_v34 = vmul.f32 -1.442695, %v409_v31  ;;  %v410_v35 = vadd.f32 %v684_v29, %v383_v33  ;;  %v765_v36 = vpop.f32.mrb[19].mxu0 }
 0x302   :  { %835 = vpow2.f32 %v635_v34  ;;  %v636_v37 = vmul.f32 -1.442695, %v410_v35 }
 0x304   :  { %v832_v38 = vpop.eup %831  ;;  %837 = vpow2.f32 %v636_v37 }
 0x305   :  { %v403_v39 = vadd.f32 1.0, %v832_v38  ;;  %v388_v41 = vpop.f32.mrb[20].mxu0 }
 0x306   :  { %v834_v42 = vpop.eup %833  ;;  %v768_v43 = vpop.f32.mrb[21].mxu0  ;;  %v423_v53 = vadd.f32 %v388_v41, %v950_v40 }
 0x307   :  { %839 = vrcp.f32 %v403_v39  ;;  %v404_v44 = vadd.f32 1.0, %v834_v42  ;;  %v391_v46 = vpop.f32.mrb[22].mxu0 }
 0x308   :  { %v769_v47 = vpop.f32.mrb[23].mxu0  ;;  %v424_v58 = vadd.f32 %v391_v46, %v955_v45 }
 0x309   :  { %841 = vrcp.f32 %v404_v44 }
 0x30c   :  { %v836_v48 = vpop.eup %835 }
 0x30d   :  { %v417_v51 = vadd.f32 1.0, %v836_v48  ;;  %v711_v48 = vld [vmem:[%s1099_s0 + $0x58] sm:$0xff]  }
 0x30e   :  { %v838_v50 = vpop.eup %837 }
 0x30f   :  { %v418_v55 = vadd.f32 1.0, %v838_v50  ;;  %843 = vrcp.f32 %v417_v51  ;;  %v699_v51 = vunpack.c.l.bf16 %v711_v48 }
 0x311   :  { %v840_v54 = vpop.eup %839  ;;  %845 = vrcp.f32 %v418_v55 }
 0x312   :  { %v425_v56 = vmul.f32 %v840_v54, %v423_v53 }
 0x313   :  { %v842_v59 = vpop.eup %841 }
 0x314   :  { %v427_v60 = vadd.f32 %v687_v52, %v425_v56  ;;  %v426_v61 = vmul.f32 %v842_v59, %v424_v58  ;;  %v700_v56 = vunpack.c.h.bf16 %v711_v48 }
 0x316   :  { %847 = vtanh.f32 %v427_v60  ;;  %v428_v62 = vadd.f32 %v688_v57, %v426_v61 }
 0x318   :  { %849 = vtanh.f32 %v428_v62 }
 0x319   :  { %v844_v63 = vpop.eup %843 }
 0x31a   :  { %v431_v1 = vsub.f32 1.0, %v844_v63  ;;  %v435_v12 = vmul.f32 %v844_v63, %v1005_v5 }
 0x31b   :  { %v846_v2 = vpop.eup %845 }
 0x31c   :  { %v432_v11 = vsub.f32 1.0, %v846_v2  ;;  %v436_v6 = vmul.f32 %v846_v2, %v1007_v13  ;;  %v709_v13 = vld [vmem:[%s1099_s0 + $0x48] sm:$0xff]  }
 0x31d   :  { %v691_v20 = vunpack.c.l.bf16 %v709_v13  ;;  %v692_v21 = vunpack.c.h.bf16 %v709_v13 }
 0x320   :  { %v848_v3 = vpop.eup %847 }
 0x321   :  { %v433_v4 = vmul.f32 %v848_v3, %v431_v1 }
 0x322   :  { %v850_v14 = vpop.eup %849 }
 0x323   :  { %v434_v15 = vmul.f32 %v850_v14, %v432_v11  ;;  %v1046_v16 = vadd.f32 %v435_v12, %v433_v4 }
 0x325   :  { %v1048_v10 = vadd.f32 %v436_v6, %v434_v15  ;;  %v441_v17 = vpack.c.bf16 %v1046_v16, %v1046_v16 }
 0x327   :  { %637 = vst.msk [vmem:[%s1100_s3 + $0x10] sm:$0xf] %vm186_vm3, %v441_v17  ;;  %v445_v18 = vpack.c.bf16 %v1048_v10, %v1048_v10  ;;  %v465_v5 = vpack.c.bf16 %v1048_v10, %v1046_v16 }
 0x329   :  { %v447_v19 = vrot.slane %v445_v18, 4  ;;  %771 = vmatpush3.bf16.msra.mxu1 %v465_v5 }
 0x32b   :  { %638 = vst.msk [vmem:[%s1100_s3 + $0x8] sm:$0xf0] %vm194_vm4, %v447_v19 }
 0x32c   :  { %773 = vmatmul.mubr.msk.bf16.vlgmr.msra.gmra.mrb[12].mxu1 %vm61_vm2, %v919_v7 }
 0x32d   :  { %776 = vmatprep.mubr.msk.bf16.mxu1 %vm872_vm1, %v871_v0 }
 0x334   :  { %777 = vmatmul.mubr.msk.bf16.gmra.mrb[16].mxu1 %vm61_vm2, %v929_v8  ;;  %v710_v8 = vld [vmem:[%s1099_s0 + $0x50] sm:$0xff]  }
 0x335   :  { %780 = vmatprep.mubr.msk.bf16.mxu1 %vm872_vm1, %v871_v0  ;;  %v696_v28 = vunpack.c.h.bf16 %v710_v8 }
 0x33c   :  { %781 = vmatmul.mubr.msk.bf16.gmra.mrb[20].mxu1 %vm61_vm2, %v938_v9  ;;  %v695_v9 = vunpack.c.l.bf16 %v710_v8 }
 0x3ff   :  { %v500_v22 = vpop.f32.mrb[12].mxu1 }
 0x400   :  { %v523_v7 = vadd.f32 %v691_v20, %v500_v22  ;;  %v774_v23 = vpop.f32.mrb[13].mxu1 }
 0x401   :  { %v503_v24 = vpop.f32.mrb[14].mxu1 }
 0x402   :  { %v648_v25 = vmul.f32 -1.442695, %v523_v7  ;;  %v524_v26 = vadd.f32 %v692_v21, %v503_v24  ;;  %v775_v0 = vpop.f32.mrb[15].mxu1 }
 0x404   :  { %851 = vpow2.f32 %v648_v25  ;;  %v649_v27 = vmul.f32 -1.442695, %v524_v26 }
 0x406   :  { %853 = vpow2.f32 %v649_v27 }
 0x407   :  { %v508_v29 = vpop.f32.mrb[16].mxu1 }
 0x408   :  { %v537_v30 = vadd.f32 %v695_v9, %v508_v29  ;;  %v778_v31 = vpop.f32.mrb[17].mxu1 }
 0x409   :  { %v511_v32 = vpop.f32.mrb[18].mxu1 }
 0x40a   :  { %v650_v33 = vmul.f32 -1.442695, %v537_v30  ;;  %v538_v34 = vadd.f32 %v696_v28, %v511_v32  ;;  %v779_v35 = vpop.f32.mrb[19].mxu1 }
 0x40c   :  { %855 = vpow2.f32 %v650_v33  ;;  %v651_v36 = vmul.f32 -1.442695, %v538_v34 }
 0x40e   :  { %v852_v37 = vpop.eup %851  ;;  %857 = vpow2.f32 %v651_v36 }
 0x40f   :  { %v531_v38 = vadd.f32 1.0, %v852_v37  ;;  %v516_v39 = vpop.f32.mrb[20].mxu1 }
 0x410   :  { %v854_v41 = vpop.eup %853  ;;  %v782_v42 = vpop.f32.mrb[21].mxu1  ;;  %v551_v52 = vadd.f32 %v516_v39, %v950_v40 }
 0x411   :  { %859 = vrcp.f32 %v531_v38  ;;  %v532_v43 = vadd.f32 1.0, %v854_v41  ;;  %v519_v44 = vpop.f32.mrb[22].mxu1 }
 0x412   :  { %v783_v46 = vpop.f32.mrb[23].mxu1  ;;  %v552_v57 = vadd.f32 %v519_v44, %v955_v45 }
 0x413   :  { %861 = vrcp.f32 %v532_v43 }
 0x416   :  { %v856_v47 = vpop.eup %855 }
 0x417   :  { %v545_v50 = vadd.f32 1.0, %v856_v47 }
 0x418   :  { %v858_v49 = vpop.eup %857 }
 0x419   :  { %v546_v54 = vadd.f32 1.0, %v858_v49  ;;  %863 = vrcp.f32 %v545_v50 }
 0x41b   :  { %v860_v53 = vpop.eup %859  ;;  %865 = vrcp.f32 %v546_v54 }
 0x41c   :  { %v553_v55 = vmul.f32 %v860_v53, %v551_v52 }
 0x41d   :  { %v862_v58 = vpop.eup %861 }
 0x41e   :  { %v555_v59 = vadd.f32 %v699_v51, %v553_v55  ;;  %v554_v60 = vmul.f32 %v862_v58, %v552_v57 }
 0x420   :  { %867 = vtanh.f32 %v555_v59  ;;  %v556_v61 = vadd.f32 %v700_v56, %v554_v60 }
 0x422   :  { %869 = vtanh.f32 %v556_v61 }
 0x423   :  { %v864_v62 = vpop.eup %863 }
 0x424   :  { %v559_v63 = vsub.f32 1.0, %v864_v62  ;;  %v563_v40 = vmul.f32 %v864_v62, %v1046_v16 }
 0x425   :  { %v866_v1 = vpop.eup %865 }
 0x426   :  { %v560_v3 = vsub.f32 1.0, %v866_v1  ;;  %v564_v12 = vmul.f32 %v866_v1, %v1048_v10 }
 0x42a   :  { %v868_v2 = vpop.eup %867 }
 0x42b   :  { %v561_v11 = vmul.f32 %v868_v2, %v559_v63 }
 0x42c   :  { %v870_v4 = vpop.eup %869 }
 0x42d   :  { %v565_v14 = vadd.f32 %v563_v40, %v561_v11  ;;  %v562_v45 = vmul.f32 %v870_v4, %v560_v3 }
 0x42f   :  { %v569_v15 = vpack.c.bf16 %v565_v14, %v565_v14  ;;  %581 = vst.msk [vmem:[#allocation2] sm:$0xff] %vm19_vm0, %v565_v14  ;;  %v566_v6 = vadd.f32 %v564_v12, %v562_v45 }
 0x431   :  { %652 = vst.msk [vmem:[%s1100_s3 + $0x18] sm:$0xf] %vm186_vm3, %v569_v15  ;;  %v573_v17 = vpack.c.bf16 %v566_v6, %v566_v6 }
 0x432   :  { %582 = vst.msk [vmem:[#allocation2 + $0x8] sm:$0xff] %vm19_vm0, %v566_v6 }
 0x433   :  { %v575_v16 = vrot.slane %v573_v17, 4 }
 0x435   :  { %579 = vst.msk [vmem:[%s1100_s3] sm:$0xf0] %vm194_vm4, %v575_v16 }

// kernel: patch_unified_forward.5
= control target key start
LH: loop header
LB: loop body
LE: loop exit
PB: predicated region body
PF: predicated region fallthrough
CT: control target
= control target key end

     0   :  { %vm19_vm0 = vcmask 64512   ;;  %v866_v0 = vmov 0.0   ;;  %vm867_vm1 = vmmov 0   ;;  %v868_v1 = vmov 0   ;;  %s1092_s1 = inlined_call_operand.vmem [shape: bf16[48,16], index: 1, kind: input, shape index: {}]   ;;  %s1093_s2 = inlined_call_operand.vmem [shape: f32[16,1], index: 2, kind: input, shape index: {}]   ;;  %s1094_s0 = inlined_call_operand.vmem [shape: bf16[4,48,8], index: 0, kind: input, shape index: {}]   ;;  %s1095_s3 = inlined_call_operand.vmem [shape: bf16[4,16,8], index: 3, kind: output, shape index: {}]  }
   0x1   :  { %723 = vmatprep.subr.bf16.mxu0 %v866_v0  ;;  %20 = vst.msk [vmem:[#allocation2] sm:$0xff] %vm19_vm0, %v866_v0  ;;  %21 = vst.msk [vmem:[#allocation2 + $0x8] sm:$0xff] %vm19_vm0, %v866_v0  ;;  %725 = vmatprep.mubr.msk.bf16.mxu0 %vm867_vm1, %v866_v0  ;;  %v28_v2 = vld [vmem:[%s1093_s2] sm:$0xff]  ;;  %v29_v3 = vld [vmem:[%s1093_s2 + $0x8] sm:$0xff]  ;;  %vm61_vm2 = vcmask 130048   ;;  %vm187_vm3 = vcmask 60416  }
   0x2   :  { %782 = vset.pattern.permute.xlu0 %v868_v1  ;;  %737 = vmatprep.subr.bf16.mxu1 %v866_v0  ;;  %v914_v7 = vld [vmem:[%s1092_s1] sm:$0xff]   ;;  %v924_v8 = vld [vmem:[%s1092_s1 + $0x8] sm:$0xff]   ;;  %v933_v9 = vld [vmem:[%s1092_s1 + $0x10] sm:$0xff]  }
   0x3   :  { %739 = vmatprep.mubr.msk.bf16.mxu1 %vm867_vm1, %v866_v0  ;;  %158 = vperm.xlu0 %782, %v28_v2   ;;  %v649_v10 = vld [vmem:[%s1094_s0] sm:$0xff]   ;;  %v696_v17 = vld [vmem:[%s1094_s0 + $0x8] sm:$0xff]   ;;  %v697_v43 = vld [vmem:[%s1094_s0 + $0x10] sm:$0xff]  }
   0x4   :  { %v650_v11 = vunpack.c.l.bf16 %v649_v10  ;;  %v651_v12 = vunpack.c.h.bf16 %v649_v10  ;;  %v654_v22 = vunpack.c.l.bf16 %v696_v17  ;;  %v655_v23 = vunpack.c.h.bf16 %v696_v17 }
   0x5   :  { %v658_v47 = vunpack.c.l.bf16 %v697_v43  ;;  %v659_v51 = vunpack.c.h.bf16 %v697_v43 }
   0x7   :  { %163 = vperm.xlu0 %782, %v29_v3  }
   0x8   :  { %v905_v4 = vld [vmem:[#allocation2] sm:$0xff]  ;;  %v907_v5 = vld [vmem:[#allocation2 + $0x8] sm:$0xff] }
   0x9   :  { %v45_v6 = vpack.c.bf16 %v907_v5, %v905_v4 }
   0xb   :  { %724 = vmatpush3.bf16.msra.mxu0 %v45_v6 }
   0xc   :  { %751 = vmatprep.subr.bf16.mxu0 %v866_v0 }
   0xe   :  { %726 = vmatmul.mubr.msk.bf16.vlgmr.msra.gmra.mrb[0].mxu0 %vm61_vm2, %v914_v7 }
   0xf   :  { %729 = vmatprep.mubr.msk.bf16.mxu0 %vm867_vm1, %v866_v0 }
  0x16   :  { %730 = vmatmul.mubr.msk.bf16.gmra.mrb[4].mxu0 %vm61_vm2, %v924_v8 }
  0x17   :  { %733 = vmatprep.mubr.msk.bf16.mxu0 %vm867_vm1, %v866_v0 }
  0x1e   :  { %734 = vmatmul.mubr.msk.bf16.gmra.mrb[8].mxu0 %vm61_vm2, %v933_v9 }
  0x1f   :  { %753 = vmatprep.mubr.msk.bf16.mxu0 %vm867_vm1, %v866_v0 }
  0x82   :  { %v945_v40 = vpop.permute.xlu0 %158 }
  0x86   :  { %v950_v45 = vpop.permute.xlu0 %163 }
  0xe1   :  { %v105_v13 = vpop.f32.mrb[0].mxu0 }
  0xe2   :  { %v128_v14 = vadd.f32 %v650_v11, %v105_v13  ;;  %v727_v15 = vpop.f32.mrb[1].mxu0 }
  0xe3   :  { %v108_v16 = vpop.f32.mrb[2].mxu0 }
  0xe4   :  { %v599_v18 = vmul.f32 -1.442695, %v128_v14  ;;  %v129_v19 = vadd.f32 %v651_v12, %v108_v16  ;;  %v728_v20 = vpop.f32.mrb[3].mxu0 }
  0xe6   :  { %786 = vpow2.f32 %v599_v18  ;;  %v600_v21 = vmul.f32 -1.442695, %v129_v19  ;;  %v699_v19 = vld [vmem:[%s1094_s0 + $0x20] sm:$0xff]  }
  0xe8   :  { %788 = vpow2.f32 %v600_v21 }
  0xe9   :  { %v113_v24 = vpop.f32.mrb[4].mxu0 }
  0xea   :  { %v142_v25 = vadd.f32 %v654_v22, %v113_v24  ;;  %v731_v26 = vpop.f32.mrb[5].mxu0  ;;  %v666_v24 = vunpack.c.l.bf16 %v699_v19 }
  0xeb   :  { %v116_v27 = vpop.f32.mrb[6].mxu0 }
  0xec   :  { %v601_v28 = vmul.f32 -1.442695, %v142_v25  ;;  %v143_v29 = vadd.f32 %v655_v23, %v116_v27  ;;  %v732_v30 = vpop.f32.mrb[7].mxu0  ;;  %v667_v25 = vunpack.c.h.bf16 %v699_v19 }
  0xee   :  { %790 = vpow2.f32 %v601_v28  ;;  %v602_v31 = vmul.f32 -1.442695, %v143_v29 }
  0xf0   :  { %v787_v32 = vpop.eup %786  ;;  %792 = vpow2.f32 %v602_v31 }
  0xf1   :  { %v136_v33 = vadd.f32 1.0, %v787_v32  ;;  %v121_v34 = vpop.f32.mrb[8].mxu0 }
  0xf2   :  { %v789_v35 = vpop.eup %788  ;;  %v735_v36 = vpop.f32.mrb[9].mxu0  ;;  %v166_v48 = vadd.f32 %v945_v40, %v121_v34 }
  0xf3   :  { %794 = vrcp.f32 %v136_v33  ;;  %v137_v37 = vadd.f32 1.0, %v789_v35  ;;  %v124_v38 = vpop.f32.mrb[10].mxu0 }
  0xf4   :  { %v736_v39 = vpop.f32.mrb[11].mxu0  ;;  %v167_v52 = vadd.f32 %v950_v45, %v124_v38 }
  0xf5   :  { %796 = vrcp.f32 %v137_v37 }
  0xf8   :  { %v791_v41 = vpop.eup %790 }
  0xf9   :  { %v150_v42 = vadd.f32 1.0, %v791_v41 }
  0xfa   :  { %v793_v44 = vpop.eup %792 }
  0xfb   :  { %798 = vrcp.f32 %v150_v42  ;;  %v151_v46 = vadd.f32 1.0, %v793_v44  ;;  %v700_v44 = vld [vmem:[%s1094_s0 + $0x28] sm:$0xff]  }
  0xfd   :  { %v795_v49 = vpop.eup %794  ;;  %800 = vrcp.f32 %v151_v46 }
  0xfe   :  { %v168_v50 = vmul.f32 %v795_v49, %v166_v48  ;;  %v670_v48 = vunpack.c.l.bf16 %v700_v44 }
  0xff   :  { %v797_v53 = vpop.eup %796 }
 0x100   :  { %v170_v54 = vadd.f32 %v658_v47, %v168_v50  ;;  %v169_v55 = vmul.f32 %v797_v53, %v167_v52  ;;  %v671_v53 = vunpack.c.h.bf16 %v700_v44 }
 0x102   :  { %802 = vtanh.f32 %v170_v54  ;;  %v171_v56 = vadd.f32 %v659_v51, %v169_v55 }
 0x104   :  { %804 = vtanh.f32 %v171_v56 }
 0x105   :  { %v799_v57 = vpop.eup %798 }
 0x106   :  { %v174_v58 = vsub.f32 1.0, %v799_v57  ;;  %v178_v63 = vmul.f32 %v799_v57, %v905_v4 }
 0x107   :  { %v801_v59 = vpop.eup %800 }
 0x108   :  { %v175_v61 = vsub.f32 1.0, %v801_v59  ;;  %v179_v3 = vmul.f32 %v801_v59, %v907_v5  ;;  %v698_v5 = vld [vmem:[%s1094_s0 + $0x18] sm:$0xff]  }
 0x109   :  { %v662_v13 = vunpack.c.l.bf16 %v698_v5  ;;  %v663_v14 = vunpack.c.h.bf16 %v698_v5 }
 0x10c   :  { %v803_v60 = vpop.eup %802 }
 0x10d   :  { %v176_v62 = vmul.f32 %v803_v60, %v174_v58 }
 0x10e   :  { %v805_v1 = vpop.eup %804 }
 0x10f   :  { %v177_v2 = vmul.f32 %v805_v1, %v175_v61  ;;  %v956_v6 = vadd.f32 %v178_v63, %v176_v62 }
 0x111   :  { %v958_v10 = vadd.f32 %v179_v3, %v177_v2  ;;  %v183_v11 = vpack.c.bf16 %v956_v6, %v956_v6 }
 0x113   :  { %188 = vst.msk [vmem:[%s1095_s3] sm:$0xf] %vm187_vm3, %v183_v11  ;;  %v189_v4 = vpack.c.bf16 %v958_v10, %v958_v10  ;;  %v207_v12 = vpack.c.bf16 %v958_v10, %v956_v6 }
 0x115   :  { %603 = vst.msk [vmem:[%s1095_s3 + $0x1c] sm:$0xf] %vm187_vm3, %v189_v4  ;;  %738 = vmatpush3.bf16.msra.mxu1 %v207_v12 }
 0x116   :  { %765 = vmatprep.subr.bf16.mxu1 %v866_v0 }
 0x118   :  { %740 = vmatmul.mubr.msk.bf16.vlgmr.msra.gmra.mrb[0].mxu1 %vm61_vm2, %v914_v7 }
 0x119   :  { %743 = vmatprep.mubr.msk.bf16.mxu1 %vm867_vm1, %v866_v0 }
 0x120   :  { %744 = vmatmul.mubr.msk.bf16.gmra.mrb[4].mxu1 %vm61_vm2, %v924_v8 }
 0x121   :  { %747 = vmatprep.mubr.msk.bf16.mxu1 %vm867_vm1, %v866_v0 }
 0x128   :  { %748 = vmatmul.mubr.msk.bf16.gmra.mrb[8].mxu1 %vm61_vm2, %v933_v9 }
 0x129   :  { %767 = vmatprep.mubr.msk.bf16.mxu1 %vm867_vm1, %v866_v0 }
 0x1eb   :  { %v242_v15 = vpop.f32.mrb[0].mxu1 }
 0x1ec   :  { %v265_v16 = vadd.f32 %v662_v13, %v242_v15  ;;  %v741_v17 = vpop.f32.mrb[1].mxu1 }
 0x1ed   :  { %v245_v18 = vpop.f32.mrb[2].mxu1 }
 0x1ee   :  { %v613_v20 = vmul.f32 -1.442695, %v265_v16  ;;  %v266_v21 = vadd.f32 %v663_v14, %v245_v18  ;;  %v742_v22 = vpop.f32.mrb[3].mxu1 }
 0x1f0   :  { %806 = vpow2.f32 %v613_v20  ;;  %v614_v23 = vmul.f32 -1.442695, %v266_v21  ;;  %v702_v21 = vld [vmem:[%s1094_s0 + $0x38] sm:$0xff]  }
 0x1f2   :  { %808 = vpow2.f32 %v614_v23 }
 0x1f3   :  { %v250_v26 = vpop.f32.mrb[4].mxu1 }
 0x1f4   :  { %v279_v27 = vadd.f32 %v666_v24, %v250_v26  ;;  %v745_v28 = vpop.f32.mrb[5].mxu1  ;;  %v678_v26 = vunpack.c.l.bf16 %v702_v21 }
 0x1f5   :  { %v253_v29 = vpop.f32.mrb[6].mxu1 }
 0x1f6   :  { %v615_v30 = vmul.f32 -1.442695, %v279_v27  ;;  %v280_v31 = vadd.f32 %v667_v25, %v253_v29  ;;  %v746_v32 = vpop.f32.mrb[7].mxu1  ;;  %v679_v27 = vunpack.c.h.bf16 %v702_v21 }
 0x1f8   :  { %810 = vpow2.f32 %v615_v30  ;;  %v616_v33 = vmul.f32 -1.442695, %v280_v31 }
 0x1fa   :  { %v807_v34 = vpop.eup %806  ;;  %812 = vpow2.f32 %v616_v33 }
 0x1fb   :  { %v273_v35 = vadd.f32 1.0, %v807_v34  ;;  %v258_v36 = vpop.f32.mrb[8].mxu1 }
 0x1fc   :  { %v809_v37 = vpop.eup %808  ;;  %v749_v38 = vpop.f32.mrb[9].mxu1  ;;  %v293_v49 = vadd.f32 %v258_v36, %v945_v40 }
 0x1fd   :  { %814 = vrcp.f32 %v273_v35  ;;  %v274_v39 = vadd.f32 1.0, %v809_v37  ;;  %v261_v41 = vpop.f32.mrb[10].mxu1 }
 0x1fe   :  { %v750_v42 = vpop.f32.mrb[11].mxu1  ;;  %v294_v54 = vadd.f32 %v261_v41, %v950_v45 }
 0x1ff   :  { %816 = vrcp.f32 %v274_v39 }
 0x202   :  { %v811_v43 = vpop.eup %810 }
 0x203   :  { %v287_v47 = vadd.f32 1.0, %v811_v43 }
 0x204   :  { %v813_v46 = vpop.eup %812 }
 0x205   :  { %v288_v51 = vadd.f32 1.0, %v813_v46  ;;  %818 = vrcp.f32 %v287_v47  ;;  %v703_v47 = vld [vmem:[%s1094_s0 + $0x40] sm:$0xff]  }
 0x207   :  { %v815_v50 = vpop.eup %814  ;;  %820 = vrcp.f32 %v288_v51 }
 0x208   :  { %v295_v52 = vmul.f32 %v815_v50, %v293_v49  ;;  %v682_v50 = vunpack.c.l.bf16 %v703_v47 }
 0x209   :  { %v817_v55 = vpop.eup %816 }
 0x20a   :  { %v297_v56 = vadd.f32 %v670_v48, %v295_v52  ;;  %v296_v57 = vmul.f32 %v817_v55, %v294_v54  ;;  %v683_v55 = vunpack.c.h.bf16 %v703_v47 }
 0x20c   :  { %822 = vtanh.f32 %v297_v56  ;;  %v298_v58 = vadd.f32 %v671_v53, %v296_v57 }
 0x20e   :  { %824 = vtanh.f32 %v298_v58 }
 0x20f   :  { %v819_v59 = vpop.eup %818 }
 0x210   :  { %v301_v60 = vsub.f32 1.0, %v819_v59  ;;  %v305_v2 = vmul.f32 %v819_v59, %v956_v6 }
 0x211   :  { %v821_v61 = vpop.eup %820 }
 0x212   :  { %v302_v63 = vsub.f32 1.0, %v821_v61  ;;  %v306_v4 = vmul.f32 %v821_v61, %v958_v10  ;;  %v701_v10 = vld [vmem:[%s1094_s0 + $0x30] sm:$0xff]  }
 0x213   :  { %v674_v15 = vunpack.c.l.bf16 %v701_v10  ;;  %v675_v16 = vunpack.c.h.bf16 %v701_v10 }
 0x216   :  { %v823_v62 = vpop.eup %822 }
 0x217   :  { %v303_v1 = vmul.f32 %v823_v62, %v301_v60 }
 0x218   :  { %v825_v3 = vpop.eup %824 }
 0x219   :  { %v304_v11 = vmul.f32 %v825_v3, %v302_v63  ;;  %v1000_v12 = vadd.f32 %v305_v2, %v303_v1 }
 0x21b   :  { %v1002_v5 = vadd.f32 %v306_v4, %v304_v11  ;;  %v311_v13 = vpack.c.bf16 %v1000_v12, %v1000_v12 }
 0x21d   :  { %617 = vst.msk [vmem:[%s1095_s3 + $0x8] sm:$0xf] %vm187_vm3, %v311_v13  ;;  %v316_v14 = vpack.c.bf16 %v1002_v5, %v1002_v5  ;;  %v334_v6 = vpack.c.bf16 %v1002_v5, %v1000_v12 }
 0x21f   :  { %618 = vst.msk [vmem:[%s1095_s3 + $0x14] sm:$0xf] %vm187_vm3, %v316_v14  ;;  %752 = vmatpush3.bf16.msra.mxu0 %v334_v6 }
 0x222   :  { %754 = vmatmul.mubr.msk.bf16.vlgmr.msra.gmra.mrb[12].mxu0 %vm61_vm2, %v914_v7 }
 0x223   :  { %757 = vmatprep.mubr.msk.bf16.mxu0 %vm867_vm1, %v866_v0 }
 0x22a   :  { %758 = vmatmul.mubr.msk.bf16.gmra.mrb[16].mxu0 %vm61_vm2, %v924_v8 }
 0x22b   :  { %761 = vmatprep.mubr.msk.bf16.mxu0 %vm867_vm1, %v866_v0 }
 0x232   :  { %762 = vmatmul.mubr.msk.bf16.gmra.mrb[20].mxu0 %vm61_vm2, %v933_v9 }
 0x2f5   :  { %v369_v17 = vpop.f32.mrb[12].mxu0 }
 0x2f6   :  { %v392_v18 = vadd.f32 %v674_v15, %v369_v17  ;;  %v755_v19 = vpop.f32.mrb[13].mxu0 }
 0x2f7   :  { %v372_v20 = vpop.f32.mrb[14].mxu0 }
 0x2f8   :  { %v628_v22 = vmul.f32 -1.442695, %v392_v18  ;;  %v393_v23 = vadd.f32 %v675_v16, %v372_v20  ;;  %v756_v24 = vpop.f32.mrb[15].mxu0 }
 0x2fa   :  { %826 = vpow2.f32 %v628_v22  ;;  %v629_v25 = vmul.f32 -1.442695, %v393_v23 }
 0x2fc   :  { %828 = vpow2.f32 %v629_v25 }
 0x2fd   :  { %v377_v28 = vpop.f32.mrb[16].mxu0 }
 0x2fe   :  { %v406_v29 = vadd.f32 %v678_v26, %v377_v28  ;;  %v759_v30 = vpop.f32.mrb[17].mxu0 }
 0x2ff   :  { %v380_v31 = vpop.f32.mrb[18].mxu0 }
 0x300   :  { %v630_v32 = vmul.f32 -1.442695, %v406_v29  ;;  %v407_v33 = vadd.f32 %v679_v27, %v380_v31  ;;  %v760_v34 = vpop.f32.mrb[19].mxu0 }
 0x302   :  { %830 = vpow2.f32 %v630_v32  ;;  %v631_v35 = vmul.f32 -1.442695, %v407_v33 }
 0x304   :  { %v827_v36 = vpop.eup %826  ;;  %832 = vpow2.f32 %v631_v35 }
 0x305   :  { %v400_v37 = vadd.f32 1.0, %v827_v36  ;;  %v385_v38 = vpop.f32.mrb[20].mxu0 }
 0x306   :  { %v829_v39 = vpop.eup %828  ;;  %v763_v41 = vpop.f32.mrb[21].mxu0  ;;  %v420_v51 = vadd.f32 %v385_v38, %v945_v40 }
 0x307   :  { %834 = vrcp.f32 %v400_v37  ;;  %v401_v42 = vadd.f32 1.0, %v829_v39  ;;  %v388_v43 = vpop.f32.mrb[22].mxu0 }
 0x308   :  { %v764_v44 = vpop.f32.mrb[23].mxu0  ;;  %v421_v56 = vadd.f32 %v388_v43, %v950_v45 }
 0x309   :  { %836 = vrcp.f32 %v401_v42  ;;  %v706_v44 = vld [vmem:[%s1094_s0 + $0x58] sm:$0xff]  }
 0x30c   :  { %v831_v46 = vpop.eup %830 }
 0x30d   :  { %v414_v49 = vadd.f32 1.0, %v831_v46 }
 0x30e   :  { %v833_v48 = vpop.eup %832 }
 0x30f   :  { %v415_v53 = vadd.f32 1.0, %v833_v48  ;;  %838 = vrcp.f32 %v414_v49  ;;  %v694_v48 = vunpack.c.l.bf16 %v706_v44 }
 0x311   :  { %v835_v52 = vpop.eup %834  ;;  %840 = vrcp.f32 %v415_v53  ;;  %v695_v53 = vunpack.c.h.bf16 %v706_v44 }
 0x312   :  { %v422_v54 = vmul.f32 %v835_v52, %v420_v51 }
 0x313   :  { %v837_v57 = vpop.eup %836 }
 0x314   :  { %v424_v58 = vadd.f32 %v682_v50, %v422_v54  ;;  %v423_v59 = vmul.f32 %v837_v57, %v421_v56 }
 0x316   :  { %842 = vtanh.f32 %v424_v58  ;;  %v425_v60 = vadd.f32 %v683_v55, %v423_v59 }
 0x318   :  { %844 = vtanh.f32 %v425_v60 }
 0x319   :  { %v839_v61 = vpop.eup %838 }
 0x31a   :  { %v428_v62 = vsub.f32 1.0, %v839_v61  ;;  %v432_v11 = vmul.f32 %v839_v61, %v1000_v12 }
 0x31b   :  { %v841_v63 = vpop.eup %840 }
 0x31c   :  { %v429_v2 = vsub.f32 1.0, %v841_v63  ;;  %v433_v14 = vmul.f32 %v841_v63, %v1002_v5  ;;  %v704_v5 = vld [vmem:[%s1094_s0 + $0x48] sm:$0xff]  }
 0x31d   :  { %v686_v17 = vunpack.c.l.bf16 %v704_v5  ;;  %v687_v18 = vunpack.c.h.bf16 %v704_v5 }
 0x320   :  { %v843_v1 = vpop.eup %842 }
 0x321   :  { %v430_v3 = vmul.f32 %v843_v1, %v428_v62 }
 0x322   :  { %v845_v4 = vpop.eup %844 }
 0x323   :  { %v431_v13 = vmul.f32 %v845_v4, %v429_v2  ;;  %v1041_v6 = vadd.f32 %v432_v11, %v430_v3 }
 0x325   :  { %v1043_v10 = vadd.f32 %v433_v14, %v431_v13  ;;  %v438_v15 = vpack.c.bf16 %v1041_v6, %v1041_v6 }
 0x327   :  { %632 = vst.msk [vmem:[%s1095_s3 + $0x10] sm:$0xf] %vm187_vm3, %v438_v15  ;;  %v443_v16 = vpack.c.bf16 %v1043_v10, %v1043_v10  ;;  %v461_v12 = vpack.c.bf16 %v1043_v10, %v1041_v6 }
 0x329   :  { %633 = vst.msk [vmem:[%s1095_s3 + $0xc] sm:$0xf] %vm187_vm3, %v443_v16  ;;  %766 = vmatpush3.bf16.msra.mxu1 %v461_v12 }
 0x32c   :  { %768 = vmatmul.mubr.msk.bf16.vlgmr.msra.gmra.mrb[12].mxu1 %vm61_vm2, %v914_v7 }
 0x32d   :  { %771 = vmatprep.mubr.msk.bf16.mxu1 %vm867_vm1, %v866_v0 }
 0x334   :  { %772 = vmatmul.mubr.msk.bf16.gmra.mrb[16].mxu1 %vm61_vm2, %v924_v8  ;;  %v705_v8 = vld [vmem:[%s1094_s0 + $0x50] sm:$0xff]  }
 0x335   :  { %775 = vmatprep.mubr.msk.bf16.mxu1 %vm867_vm1, %v866_v0  ;;  %v691_v25 = vunpack.c.h.bf16 %v705_v8 }
 0x33c   :  { %776 = vmatmul.mubr.msk.bf16.gmra.mrb[20].mxu1 %vm61_vm2, %v933_v9  ;;  %v690_v9 = vunpack.c.l.bf16 %v705_v8 }
 0x3ff   :  { %v496_v19 = vpop.f32.mrb[12].mxu1 }
 0x400   :  { %v519_v7 = vadd.f32 %v686_v17, %v496_v19  ;;  %v769_v20 = vpop.f32.mrb[13].mxu1 }
 0x401   :  { %v499_v21 = vpop.f32.mrb[14].mxu1 }
 0x402   :  { %v643_v22 = vmul.f32 -1.442695, %v519_v7  ;;  %v520_v23 = vadd.f32 %v687_v18, %v499_v21  ;;  %v770_v0 = vpop.f32.mrb[15].mxu1 }
 0x404   :  { %846 = vpow2.f32 %v643_v22  ;;  %v644_v24 = vmul.f32 -1.442695, %v520_v23 }
 0x406   :  { %848 = vpow2.f32 %v644_v24 }
 0x407   :  { %v504_v26 = vpop.f32.mrb[16].mxu1 }
 0x408   :  { %v533_v27 = vadd.f32 %v690_v9, %v504_v26  ;;  %v773_v28 = vpop.f32.mrb[17].mxu1 }
 0x409   :  { %v507_v29 = vpop.f32.mrb[18].mxu1 }
 0x40a   :  { %v645_v30 = vmul.f32 -1.442695, %v533_v27  ;;  %v534_v31 = vadd.f32 %v691_v25, %v507_v29  ;;  %v774_v32 = vpop.f32.mrb[19].mxu1 }
 0x40c   :  { %850 = vpow2.f32 %v645_v30  ;;  %v646_v33 = vmul.f32 -1.442695, %v534_v31 }
 0x40e   :  { %v847_v34 = vpop.eup %846  ;;  %852 = vpow2.f32 %v646_v33 }
 0x40f   :  { %v527_v35 = vadd.f32 1.0, %v847_v34  ;;  %v512_v36 = vpop.f32.mrb[20].mxu1 }
 0x410   :  { %v849_v37 = vpop.eup %848  ;;  %v777_v38 = vpop.f32.mrb[21].mxu1  ;;  %v547_v49 = vadd.f32 %v512_v36, %v945_v40 }
 0x411   :  { %854 = vrcp.f32 %v527_v35  ;;  %v528_v39 = vadd.f32 1.0, %v849_v37  ;;  %v515_v41 = vpop.f32.mrb[22].mxu1 }
 0x412   :  { %v778_v42 = vpop.f32.mrb[23].mxu1  ;;  %v548_v54 = vadd.f32 %v515_v41, %v950_v45 }
 0x413   :  { %856 = vrcp.f32 %v528_v39 }
 0x416   :  { %v851_v43 = vpop.eup %850 }
 0x417   :  { %v541_v47 = vadd.f32 1.0, %v851_v43 }
 0x418   :  { %v853_v46 = vpop.eup %852 }
 0x419   :  { %v542_v51 = vadd.f32 1.0, %v853_v46  ;;  %858 = vrcp.f32 %v541_v47 }
 0x41b   :  { %v855_v50 = vpop.eup %854  ;;  %860 = vrcp.f32 %v542_v51 }
 0x41c   :  { %v549_v52 = vmul.f32 %v855_v50, %v547_v49 }
 0x41d   :  { %v857_v55 = vpop.eup %856 }
 0x41e   :  { %v551_v56 = vadd.f32 %v694_v48, %v549_v52  ;;  %v550_v57 = vmul.f32 %v857_v55, %v548_v54 }
 0x420   :  { %862 = vtanh.f32 %v551_v56  ;;  %v552_v58 = vadd.f32 %v695_v53, %v550_v57 }
 0x422   :  { %864 = vtanh.f32 %v552_v58 }
 0x423   :  { %v859_v59 = vpop.eup %858 }
 0x424   :  { %v555_v60 = vsub.f32 1.0, %v859_v59  ;;  %v559_v40 = vmul.f32 %v859_v59, %v1041_v6 }
 0x425   :  { %v861_v61 = vpop.eup %860 }
 0x426   :  { %v556_v63 = vsub.f32 1.0, %v861_v61  ;;  %v560_v3 = vmul.f32 %v861_v61, %v1043_v10 }
 0x42a   :  { %v863_v62 = vpop.eup %862 }
 0x42b   :  { %v557_v1 = vmul.f32 %v863_v62, %v555_v60 }
 0x42c   :  { %v865_v2 = vpop.eup %864 }
 0x42d   :  { %v561_v11 = vadd.f32 %v559_v40, %v557_v1  ;;  %v558_v45 = vmul.f32 %v865_v2, %v556_v63 }
 0x42f   :  { %v565_v4 = vpack.c.bf16 %v561_v11, %v561_v11  ;;  %576 = vst.msk [vmem:[#allocation2] sm:$0xff] %vm19_vm0, %v561_v11  ;;  %v562_v13 = vadd.f32 %v560_v3, %v558_v45 }
 0x431   :  { %647 = vst.msk [vmem:[%s1095_s3 + $0x18] sm:$0xf] %vm187_vm3, %v565_v4  ;;  %v570_v14 = vpack.c.bf16 %v562_v13, %v562_v13 }
 0x432   :  { %577 = vst.msk [vmem:[#allocation2 + $0x8] sm:$0xff] %vm19_vm0, %v562_v13 }
 0x433   :  { %574 = vst.msk [vmem:[%s1095_s3 + $0x4] sm:$0xf] %vm187_vm3, %v570_v14 }

</bundles_post_ra>
